<compile_context>
chip_gen: v7x
topology: tpu7x:2x2x1
jax: 0.10.0
libtpu: 0.0.40
codegen_flags: <defaults>
</compile_context>

<pallas_src>
import functools
import math

import jax
import jax.numpy as jnp
from jax.experimental import pallas as pl
from jax.experimental.pallas import tpu as pltpu


# ----------------------------------------------------------------------------
# Fused depthwise(KxK, dilated) + pointwise(1x1) kernel: one output row tile
# (TILE_H complete output rows) per grid step.
# ----------------------------------------------------------------------------
def _sep_conv_kernel(x_ref, *rest, K, dilation, stride, tile_h, w_out, has_halo):
    if has_halo:
        halo_ref, wdw_ref, wpw_ref, bpw_ref, o_ref = rest
    else:
        wdw_ref, wpw_ref, bpw_ref, o_ref = rest

    x_main = x_ref[0]                                   # (tile_h*stride, Wp, Cin) bf16
    if has_halo:
        # Stack the (K-1)*dilation halo rows below the main block.
        slab = jnp.concatenate([x_main, halo_ref[0]], axis=0)
    else:
        slab = x_main

    wdw = wdw_ref[...]                                  # (K*K, Cin) f32
    cin = slab.shape[-1]

    # Two independent partial accumulators -> shorter VALU dependency chain.
    acc0 = jnp.zeros((tile_h, w_out, cin), jnp.float32)
    acc1 = jnp.zeros((tile_h, w_out, cin), jnp.float32)
    tap = 0
    for kx in range(K):                                 # static unroll (taps)
        c0 = kx * dilation
        if stride == 1:
            cols = slab[:, c0:c0 + w_out, :]
        else:
            # Unit-stride load + reshape-select (no strided sublane reads).
            cols = slab[:, c0:c0 + w_out * stride, :]
            cols = cols.reshape(slab.shape[0], w_out, stride, cin)[:, :, 0, :]
        for ky in range(K):
            r0 = ky * dilation
            if stride == 1:
                win = cols[r0:r0 + tile_h]
            else:
                win = cols[r0:r0 + tile_h * stride]
                win = win.reshape(tile_h, stride, w_out, cin)[:, 0]
            w_tap = wdw[ky * K + kx:ky * K + kx + 1, :]          # (1, Cin) f32
            contrib = win.astype(jnp.float32) * w_tap            # VPU, f32 acc
            if tap % 2 == 0:
                acc0 = acc0 + contrib
            else:
                acc1 = acc1 + contrib
            tap += 1
    acc = acc0 + acc1                                   # (tile_h, w_out, Cin) f32

    # Fused pointwise 1x1 conv on the MXU.  Depthwise bias is already folded
    # into bpw in the wrapper, so no extra (M, Cin) VPU pass here.
    z = acc.reshape(tile_h * w_out, cin).astype(jnp.bfloat16)
    y = jnp.dot(z, wpw_ref[...], preferred_element_type=jnp.float32)
    y = y + bpw_ref[...]
    o_ref[0] = y.reshape(tile_h, w_out, -1).astype(o_ref.dtype)


# ----------------------------------------------------------------------------
# TILE_H selection: big enough to fill the MXU (target M ~512 rows), small
# enough to fit the VMEM budget (safe for v7x's 64 MiB physical VMEM), and a
# multiple of halo/gcd(halo, stride) so the halo BlockSpec stays plain-Blocked.
# ----------------------------------------------------------------------------
def _pick_tile_h(hout, wout, wp, cin_p, cout_p, stride, halo, kk,
                 out_bytes=2, target_m=512, vmem_budget=28 * 1024 * 1024):
    step = 1 if halo == 0 else halo // math.gcd(halo, stride)
    th = max(1, -(-target_m // wout))            # ceil(target_m / wout)
    th = -(-th // step) * step                   # round up to multiple of step
    th_max = -(-hout // step) * step             # smallest multiple covering Hout
    th = min(th, th_max)

    def est(t):                                  # rough per-step VMEM bytes
        rows_in = t * stride
        x_main = rows_in * wp * cin_p * 2 * 2            # bf16, double-buffered
        x_halo = halo * wp * cin_p * 2 * 2
        out_b = t * wout * cout_p * out_bytes * 2
        acc_b = t * wout * cin_p * 4 * 3                 # f32 acc + slice temps
        mm_b = t * wout * cout_p * 4                     # f32 matmul result
        slab_b = (rows_in + halo) * wp * cin_p * 2       # concatenated slab
        w_b = (cin_p * cout_p * 2 + kk * cin_p * 4 + cout_p * 4) * 2
        return x_main + x_halo + out_b + acc_b + mm_b + slab_b + w_b

    while th > step and est(th) > vmem_budget:
        th -= step
    return max(th, step)


# ----------------------------------------------------------------------------
# Wrapper: NCHW in / NCHW out by default (PyTorch module parity); set
# nhwc_in/nhwc_out=True in an NHWC pipeline to skip the extra HBM transposes.
# ----------------------------------------------------------------------------
def atrous_separable_conv(x_in, w_dw, b_dw, w_pw, b_pw, *,
                          stride=1, padding=0, dilation=1,
                          out_dtype=jnp.bfloat16,
                          nhwc_in=False, nhwc_out=False):
    """
    x_in:  (N, Cin, H, W)  (or (N, H, W, Cin) if nhwc_in)
    w_dw:  (Cin, 1, K, K)   depthwise conv weight (groups=Cin, PyTorch layout)
    b_dw:  (Cin,)
    w_pw:  (Cout, Cin, 1, 1) pointwise conv weight
    b_pw:  (Cout,)
    returns (N, Cout, Hout, Wout)  (or NHWC if nhwc_out)
    """
    if nhwc_in:
        N, H, W, Cin = map(int, x_in.shape)
        x_nhwc = x_in
    else:
        N, Cin, H, W = map(int, x_in.shape)
        x_nhwc = jnp.transpose(x_in, (0, 2, 3, 1))
    K = int(w_dw.shape[-1])
    Cout = int(w_pw.shape[0])
    assert stride >= 1 and dilation >= 1 and K >= 1

    Hout = (H + 2 * padding - dilation * (K - 1) - 1) // stride + 1
    Wout = (W + 2 * padding - dilation * (K - 1) - 1) // stride + 1
    assert Hout > 0 and Wout > 0

    halo = (K - 1) * dilation
    # Lane-align channels (no-op / no extra HBM bytes when already aligned).
    Cin_p = -(-Cin // 128) * 128
    Cout_p = -(-Cout // 128) * 128

    # Spatial extent actually read along W by the kernel's static slices.
    w_need = halo + (Wout * stride if stride > 1 else Wout)
    Wp = max(W + 2 * padding, w_need)

    tile_h = _pick_tile_h(Hout, Wout, Wp, Cin_p, Cout_p, stride, halo, K * K,
                          out_bytes=jnp.dtype(out_dtype).itemsize)
    num_tiles = -(-Hout // tile_h)
    in_rows = tile_h * stride
    h_need = num_tiles * in_rows + halo
    Hp = max(H + 2 * padding, h_need)

    # NHWC bf16 in HBM; zero-pad spatial + channel dims in one fused XLA op.
    x = x_nhwc.astype(jnp.bfloat16)
    x = jnp.pad(x, ((0, 0),
                    (padding, Hp - H - padding),
                    (padding, Wp - W - padding),
                    (0, Cin_p - Cin)))

    # Depthwise weight (Cin,1,K,K) -> (K*K, Cin_p) f32.
    wdw = jnp.transpose(w_dw[:, 0, :, :], (1, 2, 0)).reshape(K * K, Cin)
    wdw = jnp.pad(wdw, ((0, 0), (0, Cin_p - Cin))).astype(jnp.float32)

    # Pointwise weight (Cout,Cin,1,1) -> (Cin_p, Cout_p) bf16, and fold the
    # depthwise bias into the pointwise bias: (acc+b)W + c == accW + (bW + c).
    wpw_f32 = jnp.transpose(w_pw[:, :, 0, 0], (1, 0)).astype(jnp.float32)
    bpw_eff = b_pw.astype(jnp.float32) + b_dw.astype(jnp.float32) @ wpw_f32
    wpw = jnp.pad(wpw_f32.astype(jnp.bfloat16),
                  ((0, Cin_p - Cin), (0, Cout_p - Cout)))
    bpw = jnp.pad(bpw_eff, (0, Cout_p - Cout)).reshape(1, Cout_p)

    has_halo = halo > 0
    bpt = (in_rows // halo) if has_halo else 0   # in_rows is a multiple of halo

    kernel = functools.partial(_sep_conv_kernel, K=K, dilation=dilation,
                               stride=stride, tile_h=tile_h, w_out=Wout,
                               has_halo=has_halo)

    in_specs = [
        # main input slab for this row tile (non-overlapping, plain Blocked)
        pl.BlockSpec((1, in_rows, Wp, Cin_p), lambda n, t: (n, t, 0, 0)),
    ]
    inputs = [x]
    if has_halo:
        # (K-1)*dilation halo rows directly below the main slab
        in_specs.append(pl.BlockSpec((1, halo, Wp, Cin_p),
                                     lambda n, t: (n, (t + 1) * bpt, 0, 0)))
        inputs.append(x)
    in_specs += [
        # resident weights/bias: constant index_map -> DMA'd once
        pl.BlockSpec((K * K, Cin_p), lambda n, t: (0, 0)),
        pl.BlockSpec((Cin_p, Cout_p), lambda n, t: (0, 0)),
        pl.BlockSpec((1, Cout_p), lambda n, t: (0, 0)),
    ]
    inputs += [wdw, wpw, bpw]

    out = pl.pallas_call(
        kernel,
        out_shape=jax.ShapeDtypeStruct(
            (N, num_tiles * tile_h, Wout, Cout_p), out_dtype),
        grid_spec=pltpu.PrefetchScalarGridSpec(
            num_scalar_prefetch=0,
            grid=(N, num_tiles),
            in_specs=in_specs,
            out_specs=pl.BlockSpec((1, tile_h, Wout, Cout_p),
                                   lambda n, t: (n, t, 0, 0)),
        ),
        compiler_params=pltpu.CompilerParams(
            # disjoint output tiles, no carried state -> both axes parallel
            dimension_semantics=("parallel", "parallel"),
            vmem_limit_bytes=48 * 1024 * 1024),
    )(*inputs)

    out = out[:, :Hout, :, :Cout]                # drop H / lane padding
    if nhwc_out:
        return out
    return jnp.transpose(out, (0, 3, 1, 2))      # NHWC -> NCHW


# ----------------------------------------------------------------------------
# Pure-JAX reference (for correctness check)
# ----------------------------------------------------------------------------
def _reference_forward(x, w_dw, b_dw, w_pw, b_pw, *, stride, padding, dilation):
    Cin = x.shape[1]
    y = jax.lax.conv_general_dilated(
        x, w_dw, window_strides=(stride, stride),
        padding=((padding, padding), (padding, padding)),
        rhs_dilation=(dilation, dilation),
        dimension_numbers=('NCHW', 'OIHW', 'NCHW'),
        feature_group_count=Cin)
    y = y + b_dw[None, :, None, None]
    z = jax.lax.conv_general_dilated(
        y, w_pw, window_strides=(1, 1), padding='VALID',
        dimension_numbers=('NCHW', 'OIHW', 'NCHW'))
    return z + b_pw[None, :, None, None]


if __name__ == "__main__":
    key = jax.random.PRNGKey(0)
    k_x, k_wdw, k_bdw, k_wpw, k_bpw = jax.random.split(key, 5)

    # Small shapes consistent with the module.
    N, Cin, H, W = 2, 32, 16, 16
    Cout, K = 64, 3
    stride, dilation = 1, 2
    padding = dilation       # "same"-style padding used by DeepLab sep convs

    # kaiming_normal_-style init, like the module's _init_weight.
    w_dw = jax.random.normal(k_wdw, (Cin, 1, K, K), jnp.float32) * jnp.sqrt(2.0 / (K * K))
    w_pw = jax.random.normal(k_wpw, (Cout, Cin, 1, 1), jnp.float32) * jnp.sqrt(2.0 / Cin)
    b_dw = (jax.random.uniform(k_bdw, (Cin,), jnp.float32) - 0.5) * 0.2
    b_pw = (jax.random.uniform(k_bpw, (Cout,), jnp.float32) - 0.5) * 0.2
    x = jax.random.normal(k_x, (N, Cin, H, W), jnp.float32)

    fwd = jax.jit(functools.partial(atrous_separable_conv,
                                    stride=stride, padding=padding,
                                    dilation=dilation))
    out = jax.block_until_ready(fwd(x, w_dw, b_dw, w_pw, b_pw))

    ref = _reference_forward(x, w_dw, b_dw, w_pw, b_pw,
                             stride=stride, padding=padding, dilation=dilation)

    assert out.shape == ref.shape == (N, Cout, H, W), (out.shape, ref.shape)
    out_f32 = out.astype(jnp.float32)
    assert bool(jnp.all(jnp.isfinite(out_f32)))
    max_err = float(jnp.max(jnp.abs(out_f32 - ref)))
    scale = float(jnp.max(jnp.abs(ref))) + 1e-6
    assert max_err <= 5e-2 * scale, (max_err, scale)   # bf16 in/MXU/out tolerance
    print("KERNEL_OK")
</pallas_src>

<mosaic_0001>
module attributes {stable_mosaic.version = 11 : i64} {
  func.func @_sep_conv_kernel(%arg0: i32, %arg1: i32, %arg2: memref<1x16x20x128xbf16, #tpu.memory_space<vmem>>, %arg3: memref<1x4x20x128xbf16, #tpu.memory_space<vmem>>, %arg4: memref<9x128xf32, #tpu.memory_space<vmem>>, %arg5: memref<128x128xbf16, #tpu.memory_space<vmem>>, %arg6: memref<1x128xf32, #tpu.memory_space<vmem>>, %arg7: memref<1x16x16x128xbf16, #tpu.memory_space<vmem>>) attributes {dimension_semantics = [#tpu.dimension_semantics<parallel>, #tpu.dimension_semantics<parallel>], iteration_bounds = array<i64: 2, 1>, scalar_prefetch = 0 : i64, scratch_operands = 0 : i64, tpu.core_type = #tpu.core_type<tc>, window_params = [{transform_indices = @transform_0, window_bounds = array<i64: 1, 16, 20, 128>}, {transform_indices = @transform_1, window_bounds = array<i64: 1, 4, 20, 128>}, {pipeline_mode = #tpu.pipeline_mode<synchronous>, transform_indices = @transform_2, window_bounds = array<i64: 9, 128>}, {pipeline_mode = #tpu.pipeline_mode<synchronous>, transform_indices = @transform_3, window_bounds = array<i64: 128, 128>}, {pipeline_mode = #tpu.pipeline_mode<synchronous>, transform_indices = @transform_4, window_bounds = array<i64: 1, 128>}, {transform_indices = @transform_5, window_bounds = array<i64: 1, 16, 16, 128>}]} {
    %c0 = arith.constant 0 : index
    %c0_0 = arith.constant 0 : index
    %c0_1 = arith.constant 0 : index
    %c0_2 = arith.constant 0 : index
    %0 = vector.load %arg2[%c0, %c0_0, %c0_1, %c0_2] : memref<1x16x20x128xbf16, #tpu.memory_space<vmem>>, vector<1x16x20x128xbf16>
    %1 = vector.shape_cast %0 : vector<1x16x20x128xbf16> to vector<16x20x128xbf16>
    %c0_3 = arith.constant 0 : index
    %c0_4 = arith.constant 0 : index
    %c0_5 = arith.constant 0 : index
    %c0_6 = arith.constant 0 : index
    %2 = vector.load %arg3[%c0_3, %c0_4, %c0_5, %c0_6] : memref<1x4x20x128xbf16, #tpu.memory_space<vmem>>, vector<1x4x20x128xbf16>
    %3 = vector.shape_cast %2 : vector<1x4x20x128xbf16> to vector<4x20x128xbf16>
    %4 = tpu.concatenate %1, %3 in 0 : vector<16x20x128xbf16>, vector<4x20x128xbf16> -> vector<20x20x128xbf16>
    %c0_7 = arith.constant 0 : index
    %c0_8 = arith.constant 0 : index
    %5 = vector.load %arg4[%c0_7, %c0_8] : memref<9x128xf32, #tpu.memory_space<vmem>>, vector<9x128xf32>
    %cst = arith.constant 0.000000e+00 : f32
    %6 = vector.broadcast %cst : f32 to vector<16x16x128xf32>
    %cst_9 = arith.constant 0.000000e+00 : f32
    %7 = vector.broadcast %cst_9 : f32 to vector<16x16x128xf32>
    %8 = vector.extract_strided_slice %4 {offsets = [0, 0, 0], sizes = [20, 16, 128], strides = [1, 1, 1]} : vector<20x20x128xbf16> to vector<20x16x128xbf16>
    %9 = vector.extract_strided_slice %8 {offsets = [0, 0, 0], sizes = [16, 16, 128], strides = [1, 1, 1]} : vector<20x16x128xbf16> to vector<16x16x128xbf16>
    %10 = vector.extract_strided_slice %5 {offsets = [0, 0], sizes = [1, 128], strides = [1, 1]} : vector<9x128xf32> to vector<1x128xf32>
    %11 = arith.extf %9 : vector<16x16x128xbf16> to vector<16x16x128xf32>
    %12 = vector.shape_cast %10 : vector<1x128xf32> to vector<1x1x128xf32>
    %13 = vector.broadcast %12 : vector<1x1x128xf32> to vector<16x16x128xf32>
    %14 = arith.mulf %11, %13 : vector<16x16x128xf32>
    %15 = arith.addf %6, %14 : vector<16x16x128xf32>
    %16 = vector.extract_strided_slice %8 {offsets = [2, 0, 0], sizes = [16, 16, 128], strides = [1, 1, 1]} : vector<20x16x128xbf16> to vector<16x16x128xbf16>
    %17 = vector.extract_strided_slice %5 {offsets = [3, 0], sizes = [1, 128], strides = [1, 1]} : vector<9x128xf32> to vector<1x128xf32>
    %18 = arith.extf %16 : vector<16x16x128xbf16> to vector<16x16x128xf32>
    %19 = vector.shape_cast %17 : vector<1x128xf32> to vector<1x1x128xf32>
    %20 = vector.broadcast %19 : vector<1x1x128xf32> to vector<16x16x128xf32>
    %21 = arith.mulf %18, %20 : vector<16x16x128xf32>
    %22 = arith.addf %7, %21 : vector<16x16x128xf32>
    %23 = vector.extract_strided_slice %8 {offsets = [4, 0, 0], sizes = [16, 16, 128], strides = [1, 1, 1]} : vector<20x16x128xbf16> to vector<16x16x128xbf16>
    %24 = vector.extract_strided_slice %5 {offsets = [6, 0], sizes = [1, 128], strides = [1, 1]} : vector<9x128xf32> to vector<1x128xf32>
    %25 = arith.extf %23 : vector<16x16x128xbf16> to vector<16x16x128xf32>
    %26 = vector.shape_cast %24 : vector<1x128xf32> to vector<1x1x128xf32>
    %27 = vector.broadcast %26 : vector<1x1x128xf32> to vector<16x16x128xf32>
    %28 = arith.mulf %25, %27 : vector<16x16x128xf32>
    %29 = arith.addf %15, %28 : vector<16x16x128xf32>
    %30 = vector.extract_strided_slice %4 {offsets = [0, 2, 0], sizes = [20, 16, 128], strides = [1, 1, 1]} : vector<20x20x128xbf16> to vector<20x16x128xbf16>
    %31 = vector.extract_strided_slice %30 {offsets = [0, 0, 0], sizes = [16, 16, 128], strides = [1, 1, 1]} : vector<20x16x128xbf16> to vector<16x16x128xbf16>
    %32 = vector.extract_strided_slice %5 {offsets = [1, 0], sizes = [1, 128], strides = [1, 1]} : vector<9x128xf32> to vector<1x128xf32>
    %33 = arith.extf %31 : vector<16x16x128xbf16> to vector<16x16x128xf32>
    %34 = vector.shape_cast %32 : vector<1x128xf32> to vector<1x1x128xf32>
    %35 = vector.broadcast %34 : vector<1x1x128xf32> to vector<16x16x128xf32>
    %36 = arith.mulf %33, %35 : vector<16x16x128xf32>
    %37 = arith.addf %22, %36 : vector<16x16x128xf32>
    %38 = vector.extract_strided_slice %30 {offsets = [2, 0, 0], sizes = [16, 16, 128], strides = [1, 1, 1]} : vector<20x16x128xbf16> to vector<16x16x128xbf16>
    %39 = vector.extract_strided_slice %5 {offsets = [4, 0], sizes = [1, 128], strides = [1, 1]} : vector<9x128xf32> to vector<1x128xf32>
    %40 = arith.extf %38 : vector<16x16x128xbf16> to vector<16x16x128xf32>
    %41 = vector.shape_cast %39 : vector<1x128xf32> to vector<1x1x128xf32>
    %42 = vector.broadcast %41 : vector<1x1x128xf32> to vector<16x16x128xf32>
    %43 = arith.mulf %40, %42 : vector<16x16x128xf32>
    %44 = arith.addf %29, %43 : vector<16x16x128xf32>
    %45 = vector.extract_strided_slice %30 {offsets = [4, 0, 0], sizes = [16, 16, 128], strides = [1, 1, 1]} : vector<20x16x128xbf16> to vector<16x16x128xbf16>
    %46 = vector.extract_strided_slice %5 {offsets = [7, 0], sizes = [1, 128], strides = [1, 1]} : vector<9x128xf32> to vector<1x128xf32>
    %47 = arith.extf %45 : vector<16x16x128xbf16> to vector<16x16x128xf32>
    %48 = vector.shape_cast %46 : vector<1x128xf32> to vector<1x1x128xf32>
    %49 = vector.broadcast %48 : vector<1x1x128xf32> to vector<16x16x128xf32>
    %50 = arith.mulf %47, %49 : vector<16x16x128xf32>
    %51 = arith.addf %37, %50 : vector<16x16x128xf32>
    %52 = vector.extract_strided_slice %4 {offsets = [0, 4, 0], sizes = [20, 16, 128], strides = [1, 1, 1]} : vector<20x20x128xbf16> to vector<20x16x128xbf16>
    %53 = vector.extract_strided_slice %52 {offsets = [0, 0, 0], sizes = [16, 16, 128], strides = [1, 1, 1]} : vector<20x16x128xbf16> to vector<16x16x128xbf16>
    %54 = vector.extract_strided_slice %5 {offsets = [2, 0], sizes = [1, 128], strides = [1, 1]} : vector<9x128xf32> to vector<1x128xf32>
    %55 = arith.extf %53 : vector<16x16x128xbf16> to vector<16x16x128xf32>
    %56 = vector.shape_cast %54 : vector<1x128xf32> to vector<1x1x128xf32>
    %57 = vector.broadcast %56 : vector<1x1x128xf32> to vector<16x16x128xf32>
    %58 = arith.mulf %55, %57 : vector<16x16x128xf32>
    %59 = arith.addf %44, %58 : vector<16x16x128xf32>
    %60 = vector.extract_strided_slice %52 {offsets = [2, 0, 0], sizes = [16, 16, 128], strides = [1, 1, 1]} : vector<20x16x128xbf16> to vector<16x16x128xbf16>
    %61 = vector.extract_strided_slice %5 {offsets = [5, 0], sizes = [1, 128], strides = [1, 1]} : vector<9x128xf32> to vector<1x128xf32>
    %62 = arith.extf %60 : vector<16x16x128xbf16> to vector<16x16x128xf32>
    %63 = vector.shape_cast %61 : vector<1x128xf32> to vector<1x1x128xf32>
    %64 = vector.broadcast %63 : vector<1x1x128xf32> to vector<16x16x128xf32>
    %65 = arith.mulf %62, %64 : vector<16x16x128xf32>
    %66 = arith.addf %51, %65 : vector<16x16x128xf32>
    %67 = vector.extract_strided_slice %52 {offsets = [4, 0, 0], sizes = [16, 16, 128], strides = [1, 1, 1]} : vector<20x16x128xbf16> to vector<16x16x128xbf16>
    %68 = vector.extract_strided_slice %5 {offsets = [8, 0], sizes = [1, 128], strides = [1, 1]} : vector<9x128xf32> to vector<1x128xf32>
    %69 = arith.extf %67 : vector<16x16x128xbf16> to vector<16x16x128xf32>
    %70 = vector.shape_cast %68 : vector<1x128xf32> to vector<1x1x128xf32>
    %71 = vector.broadcast %70 : vector<1x1x128xf32> to vector<16x16x128xf32>
    %72 = arith.mulf %69, %71 : vector<16x16x128xf32>
    %73 = arith.addf %59, %72 : vector<16x16x128xf32>
    %74 = arith.addf %73, %66 : vector<16x16x128xf32>
    %75 = vector.shape_cast %74 : vector<16x16x128xf32> to vector<256x128xf32>
    %76 = arith.truncf %75 : vector<256x128xf32> to vector<256x128xbf16>
    %c0_10 = arith.constant 0 : index
    %c0_11 = arith.constant 0 : index
    %77 = vector.load %arg5[%c0_10, %c0_11] : memref<128x128xbf16, #tpu.memory_space<vmem>>, vector<128x128xbf16>
    %cst_12 = arith.constant dense<0.000000e+00> : vector<256x128xf32>
    %78 = tpu.matmul %76, %77, %cst_12 {dimension_numbers = #tpu.dot_dimension_numbers<[1], [0], [0], [1], [0, 0, 1, 1], [], []>} : vector<256x128xbf16>, vector<128x128xbf16>, vector<256x128xf32> -> vector<256x128xf32>
    %c0_13 = arith.constant 0 : index
    %c0_14 = arith.constant 0 : index
    %79 = vector.load %arg6[%c0_13, %c0_14] : memref<1x128xf32, #tpu.memory_space<vmem>>, vector<1x128xf32>
    %80 = vector.broadcast %79 : vector<1x128xf32> to vector<256x128xf32>
    %81 = arith.addf %78, %80 : vector<256x128xf32>
    %82 = vector.shape_cast %81 : vector<256x128xf32> to vector<16x16x128xf32>
    %83 = arith.truncf %82 : vector<16x16x128xf32> to vector<16x16x128xbf16>
    %c0_15 = arith.constant 0 : index
    %c0_16 = arith.constant 0 : index
    %c0_17 = arith.constant 0 : index
    %c0_18 = arith.constant 0 : index
    %84 = vector.load %arg7[%c0_15, %c0_16, %c0_17, %c0_18] : memref<1x16x16x128xbf16, #tpu.memory_space<vmem>>, vector<1x16x16x128xbf16>
    %85 = vector.shape_cast %84 : vector<1x16x16x128xbf16> to vector<16x16x128xbf16>
    %86 = vector.shape_cast %83 : vector<16x16x128xbf16> to vector<1x16x16x128xbf16>
    tpu.vector_store %arg7[%c0_15, %c0_16, %c0_17, %c0_18], %86 {strides = array<i32>} : memref<1x16x16x128xbf16, #tpu.memory_space<vmem>>, vector<1x16x16x128xbf16>,
    return
  }
  func.func @transform_0(%arg0: i32, %arg1: i32) -> (i32, i32, i32, i32) {
    %c0_i32 = arith.constant 0 : i32
    %c0_i32_0 = arith.constant 0 : i32
    %c0_i32_1 = arith.constant 0 : i32
    return %arg0, %arg1, %c0_i32, %c0_i32_0 : i32, i32, i32, i32
  }
  func.func @transform_1(%arg0: i32, %arg1: i32) -> (i32, i32, i32, i32) {
    %c1_i32 = arith.constant 1 : i32
    %0 = arith.addi %arg1, %c1_i32 : i32
    %c4_i32 = arith.constant 4 : i32
    %1 = arith.muli %0, %c4_i32 : i32
    %c0_i32 = arith.constant 0 : i32
    %c0_i32_0 = arith.constant 0 : i32
    %c0_i32_1 = arith.constant 0 : i32
    return %arg0, %1, %c0_i32, %c0_i32_0 : i32, i32, i32, i32
  }
  func.func @transform_2(%arg0: i32, %arg1: i32) -> (i32, i32) {
    %c0_i32 = arith.constant 0 : i32
    %c0_i32_0 = arith.constant 0 : i32
    %c0_i32_1 = arith.constant 0 : i32
    return %c0_i32, %c0_i32_0 : i32, i32
  }
  func.func @transform_3(%arg0: i32, %arg1: i32) -> (i32, i32) {
    %c0_i32 = arith.constant 0 : i32
    %c0_i32_0 = arith.constant 0 : i32
    %c0_i32_1 = arith.constant 0 : i32
    return %c0_i32, %c0_i32_0 : i32, i32
  }
  func.func @transform_4(%arg0: i32, %arg1: i32) -> (i32, i32) {
    %c0_i32 = arith.constant 0 : i32
    %c0_i32_0 = arith.constant 0 : i32
    %c0_i32_1 = arith.constant 0 : i32
    return %c0_i32, %c0_i32_0 : i32, i32
  }
  func.func @transform_5(%arg0: i32, %arg1: i32) -> (i32, i32, i32, i32) {
    %c0_i32 = arith.constant 0 : i32
    %c0_i32_0 = arith.constant 0 : i32
    %c0_i32_1 = arith.constant 0 : i32
    return %arg0, %arg1, %c0_i32, %c0_i32_0 : i32, i32, i32, i32
  }
}

</mosaic_0001>

<bundles_post_ra>
// kernel: atrous_separable_conv.1
= control target key start
LH: loop header
LB: loop body
LE: loop exit
PB: predicated region body
PF: predicated region fallthrough
CT: control target
= control target key end

     0   :  { %s3107_s18 = smov 0   ;;  %s3109_s19 = smov 0   ;;  %s4396_s0 = inlined_call_operand.vmem [shape: bf16[2,20,20,128], index: 0, kind: input, shape index: {}, may-alias: {0,1}]   ;;  %s4397_s1 = inlined_call_operand.vmem [shape: bf16[2,20,20,128], index: 1, kind: input, shape index: {}, may-alias: {0,1}]   ;;  %s4398_s2 = inlined_call_operand.vmem [shape: f32[9,128], index: 2, kind: input, shape index: {}]   ;;  %s4399_s3 = inlined_call_operand.vmem [shape: bf16[128,128], index: 3, kind: input, shape index: {}]   ;;  %s4400_s4 = inlined_call_operand.vmem [shape: f32[1,128], index: 4, kind: input, shape index: {}]   ;;  %s4401_s5 = inlined_call_operand.vmem [shape: bf16[2,16,16,128], index: 5, kind: output, shape index: {}]  }
   0x1   :  { %s3111_s20 = smov 0  }
   0x2 LB: > { %s27_s21 = sadd.s32 1, %s3071_s19  ;;  %p2701_p0 = scmp.ge.s32.totalorder %s3075_s20, 1  ;;  %s3075_s20 = sphi %s3111_s20, %s15_s20   ;;  %s3071_s19 = sphi %s3109_s19, %s4439_s19   ;;  %s3067_s18 = sphi %s3107_s18, %s4438_s18  }
   0x3   : > { %p29_p1 = scmp.ge.s32.totalorder %s27_s21, 2  ;;  %p245_p2 = scmp.lt.s32.totalorder %s3075_s20, 3 }
   0x5   : > { %s4441_s21 = smov (%p29_p1, %s27_s21), 0  ;;  %p246_p3 = pnand %p2701_p0, %p245_p2 }
   0x7   : > { %249 = sbr.rel (%p246_p3) target bundleno = 549 (0x225), region = 40 }
   0xe   : > { %v3043_v0 = vld [vmem:[%s4399_s3] sm:$0xff]   ;;  %p306_p4 = scmp.lt.s32.totalorder %s3067_s18, 1  ;;  %v442_v1 = vlaneseq  ;;  %v3044_v2 = vld [vmem:[%s4399_s3 + $0x8] sm:$0xff]   ;;  %v3045_v4 = vld [vmem:[%s4399_s3 + $0x10] sm:$0xff]   ;;  %vm770_vm0 = vcmask 1045504   ;;  %vm1507_vm1 = vcmask 1043456  }
   0xf   : > { %2952 = vmatprep.subr.bf16.mxu0 %v3043_v0  ;;  %3000 = vmatprep.subr.bf16.mxu1 %v3043_v0  ;;  %v3046_v5 = vld [vmem:[%s4399_s3 + $0x18] sm:$0xff]   ;;  %v3176_v22 = vld [vmem:[%s4398_s2] sm:$0xff]  ;;  %v3048_v45 = vld [vmem:[%s4399_s3 + $0x28] sm:$0xff]  }
  0x10   : > { %s4443_s18 = smov (!%p306_p4, %s3067_s18), 1  ;;  %2953 = vmatpush3.bf16.msra.mxu0 %v3043_v0  ;;  %3008 = vmatpush3.bf16.msra.mxu1 %v3043_v0  ;;  %v3133_v3 = vshrl.u32 %v442_v1, 7  ;;  %v3047_v28 = vld [vmem:[%s4399_s3 + $0x20] sm:$0xff]   ;;  %v3245_v58 = vld [vmem:[%s4398_s2 + $0x8] ss:$0 sm:$0xff]  ;;  %v3049_v63 = vld [vmem:[%s4399_s3 + $0x30] sm:$0xff]  }
  0x11   : > { %2954 = vmatprep.subr.bf16.mxu0 %v3044_v2  ;;  %3001 = vmatprep.subr.bf16.mxu1 %v3044_v2  ;;  %s3016_s28 = smul.u32 240, %s4443_s18  ;;  %s2752_s10 = sshll.u32 %s4443_s18, 7 }
  0x12   : > { %v444_v6 = vsub.s32 0, %v3133_v3  ;;  %v516_v7 = vsub.s32 3, %v3133_v3  ;;  %v588_v11 = vsub.s32 6, %v3133_v3  ;;  %v672_v12 = vsub.s32 1, %v3133_v3  ;;  %s4337_s12 = scalar_lea.vmem %s4401_s5, %s2752_s10 }
  0x13   : > { %s3147_s8 = scalar_lea.vmem %s4396_s0, %s3016_s28  ;;  %v919_v31 = vsub.s32 4, %v3133_v3  ;;  %v1165_v32 = vsub.s32 7, %v3133_v3  ;;  %v1409_v44 = vsub.s32 2, %v3133_v3  ;;  %s2751_s27 = sadd.s32 192, %s3016_s28 }
  0x14   : > { %2955 = vmatpush3.bf16.msra.mxu0 %v3044_v2  ;;  %3009 = vmatpush3.bf16.msra.mxu1 %v3044_v2  ;;  %v2786_v8 = vld [vmem:[%s3147_s8] sm:$0xff]   ;;  %v3153_v9 = vld [vmem:[%s3147_s8 + $0x8] sm:$0x3]  ;;  %v2905_v10 = vld [vmem:[%s3147_s8 + $0x18] sm:$0xff]   ;;  %v3180_v24 = vrot.slane %v3176_v22, %v444_v6  ;;  %v3183_v25 = vrot.slane %v3176_v22, %v516_v7  ;;  %v3186_v26 = vrot.slane %v3176_v22, %v588_v11  ;;  %s3851_s30 = scalar_lea.vmem %s4397_s1, %s2751_s27 }
  0x15   : > { %2956 = vmatprep.subr.bf16.mxu0 %v3045_v4  ;;  %3002 = vmatprep.subr.bf16.mxu1 %v3045_v4  ;;  %v3158_v13 = vunpack.c.l.bf16 %v2786_v8  ;;  %v3160_v14 = vunpack.c.h.bf16 %v2786_v8  ;;  %v3162_v15 = vunpack.c.l.bf16 %v2905_v10  ;;  %v356_v16 = vld [vmem:[%s3147_s8 + $0x20] sm:$0x3]  ;;  %v2906_v17 = vld [vmem:[%s3147_s8 + $0x30] sm:$0xff]   ;;  %v362_v18 = vld [vmem:[%s3147_s8 + $0x38] sm:$0x3]  ;;  %v3167_v19 = vunpack.c.h.bf16 %v2905_v10 }
  0x16   : > { %v3169_v20 = vunpack.c.l.bf16 %v2906_v17  ;;  %v3171_v21 = vunpack.c.h.bf16 %v2906_v17  ;;  %v654_v23 = vunpack.c.l.bf16 %v3153_v9  ;;  %v3188_v27 = vunpack.c.l.bf16 %v356_v16 }
  0x17   : > { %v3193_v29 = vunpack.c.l.bf16 %v362_v18  ;;  %v3196_v30 = vrot.slane %v3176_v22, %v672_v12  ;;  %v446_v33 = vmul.f32 %v3158_v13, %v3180_v24  ;;  %v447_v34 = vmul.f32 %v3160_v14, %v3180_v24 }
  0x18   : > { %2957 = vmatpush3.bf16.msra.mxu0 %v3045_v4  ;;  %3010 = vmatpush3.bf16.msra.mxu1 %v3045_v4  ;;  %v518_v35 = vmul.f32 %v3162_v15, %v3183_v25  ;;  %v519_v36 = vmul.f32 %v3167_v19, %v3183_v25  ;;  %v590_v37 = vmul.f32 %v3169_v20, %v3186_v26  ;;  %v1654_v10 = vsub.s32 5, %v3133_v3  ;;  %v3050_v3 = vld [vmem:[%s4399_s3 + $0x38] sm:$0xff]  }
  0x19   : > { %2958 = vmatprep.subr.bf16.mxu0 %v3046_v5  ;;  %3003 = vmatprep.subr.bf16.mxu1 %v3046_v5  ;;  %v591_v38 = vmul.f32 %v3171_v21, %v3186_v26  ;;  %v674_v39 = vmul.f32 %v3158_v13, %v3196_v30  ;;  %v675_v40 = vmul.f32 %v3160_v14, %v3196_v30 }
  0x1a   : > { %v676_v41 = vmul.f32 %v3196_v30, %v654_v23  ;;  %v3220_v42 = vrot.slane %v3176_v22, %v919_v31  ;;  %v3223_v43 = vrot.slane %v3176_v22, %v1165_v32  ;;  %v622_v46 = vadd.f32 %v590_v37, %v446_v33  ;;  %v2909_v33 = vld [vmem:[%s3147_s8 + $0x78] sm:$0xff]  }
  0x1b   : > { %v623_v47 = vadd.f32 %v591_v38, %v447_v34  ;;  %v771_v48 = vrot.slane %v674_v39, 2  ;;  %v772_v49 = vrot.slane %v675_v40, 2  ;;  %v3254_v8 = vrot.slane %v3176_v22, %v1409_v44 }
  0x1c   : > { %2959 = vmatpush3.bf16.msra.mxu0 %v3046_v5  ;;  %3011 = vmatpush3.bf16.msra.mxu1 %v3046_v5  ;;  %v774_v50 = vrot.slane %v676_v41, 2  ;;  %v921_v51 = vmul.f32 %v3162_v15, %v3220_v42  ;;  %v922_v52 = vmul.f32 %v3167_v19, %v3220_v42  ;;  %v923_v53 = vmul.f32 %v3220_v42, %v3188_v27  ;;  %v2908_v5 = vld [vmem:[%s3147_s8 + $0x60] sm:$0xff]  }
  0x1d   : > { %2960 = vmatprep.subr.bf16.mxu0 %v3047_v28  ;;  %3004 = vmatprep.subr.bf16.mxu1 %v3047_v28  ;;  %v773_v54 = vsel %vm770_vm0, %v771_v48, %v772_v49  ;;  %v1167_v55 = vmul.f32 %v3169_v20, %v3223_v43  ;;  %v1168_v56 = vmul.f32 %v3171_v21, %v3223_v43  ;;  %v3262_v32 = vunpack.c.l.bf16 %v2908_v5 }
  0x1e   : > { %v1169_v57 = vmul.f32 %v3223_v43, %v3193_v29  ;;  %v775_v59 = vsel %vm770_vm0, %v772_v49, %v774_v50  ;;  %v883_v60 = vadd.f32 %v773_v54, %v518_v35  ;;  %v1017_v61 = vrot.slane %v921_v51, 2  ;;  %v2910_v51 = vld [vmem:[%s3147_s8 + $0x90] sm:$0xff]  }
  0x1f   : > { %v1018_v62 = vrot.slane %v922_v52, 2  ;;  %v884_v0 = vadd.f32 %v775_v59, %v519_v36  ;;  %v1020_v1 = vrot.slane %v923_v53, 2  ;;  %v1263_v2 = vrot.slane %v1167_v55, 2 }
  0x20   : > { %2961 = vmatpush3.bf16.msra.mxu0 %v3047_v28  ;;  %3012 = vmatpush3.bf16.msra.mxu1 %v3047_v28  ;;  %v1264_v4 = vrot.slane %v1168_v56, 2  ;;  %v1266_v7 = vrot.slane %v1169_v57, 2  ;;  %v1900_v17 = vmul.f32 %v3169_v20, %v3245_v58  ;;  %v1411_v35 = vmul.f32 %v3158_v13, %v3254_v8 }
  0x21   : > { %2962 = vmatprep.subr.bf16.mxu0 %v3048_v45  ;;  %3005 = vmatprep.subr.bf16.mxu1 %v3048_v45  ;;  %v1019_v6 = vsel %vm770_vm0, %v1017_v61, %v1018_v62  ;;  %v1021_v11 = vsel %vm770_vm0, %v1018_v62, %v1020_v1  ;;  %v1412_v36 = vmul.f32 %v3160_v14, %v3254_v8  ;;  %v3284_v14 = vunpack.c.l.bf16 %v2909_v33 }
  0x22   : > { %v1129_v12 = vadd.f32 %v1019_v6, %v622_v46  ;;  %v1265_v16 = vsel %vm770_vm0, %v1263_v2, %v1264_v4  ;;  %v1130_v18 = vadd.f32 %v1021_v11, %v623_v47  ;;  %v1267_v28 = vsel %vm770_vm0, %v1264_v4, %v1266_v7  ;;  %v380_v6 = vld [vmem:[%s3147_s8 + $0x80] sm:$0x3]  ;;  %v386_v7 = vld [vmem:[%s3147_s8 + $0x98] sm:$0x3] }
  0x23   : > { %v1375_v31 = vadd.f32 %v1265_v16, %v883_v60  ;;  %v1376_v34 = vadd.f32 %v1267_v28, %v884_v0  ;;  %v1996_v37 = vrot.slane %v1900_v17, 4  ;;  %v1413_v38 = vmul.f32 %v3254_v8, %v654_v23  ;;  %4420 = vst [vmem:[#allocation2_spill] sm:$0xff] %v3284_v14 }
  0x24   : > { %2963 = vmatpush3.bf16.msra.mxu0 %v3048_v45  ;;  %3013 = vmatpush3.bf16.msra.mxu1 %v3048_v45  ;;  %v3276_v39 = vrot.slane %v3176_v22, %v1654_v10  ;;  %v1901_v40 = vmul.f32 %v3171_v21, %v3245_v58  ;;  %v1902_v41 = vmul.f32 %v3245_v58, %v3193_v29  ;;  %v1508_v44 = vrot.slane %v1411_v35, 4 }
  0x25   : > { %2964 = vmatprep.subr.bf16.mxu0 %v3049_v63  ;;  %3006 = vmatprep.subr.bf16.mxu1 %v3049_v63  ;;  %v1509_v13 = vrot.slane %v1412_v36, 4  ;;  %v3282_v45 = vunpack.c.h.bf16 %v2908_v5  ;;  %v1511_v9 = vrot.slane %v1413_v38, 4  ;;  %v3293_v50 = vunpack.c.h.bf16 %v2909_v33 }
  0x26   : > { %v1656_v22 = vmul.f32 %v3162_v15, %v3276_v39  ;;  %v1657_v23 = vmul.f32 %v3167_v19, %v3276_v39  ;;  %v1658_v46 = vmul.f32 %v3276_v39, %v3188_v27  ;;  %v1997_v48 = vrot.slane %v1901_v40, 4 }
  0x27   : > { %v1510_v47 = vsel %vm1507_vm1, %v1508_v44, %v1509_v13  ;;  %v1999_v49 = vrot.slane %v1902_v41, 4  ;;  %4421 = vst [vmem:[#allocation3_spill] sm:$0xff] %v3293_v50  ;;  %v1512_v52 = vsel %vm1507_vm1, %v1509_v13, %v1511_v9  ;;  %v3301_v0 = vunpack.c.l.bf16 %v2910_v51 }
  0x28   : > { %2965 = vmatpush3.bf16.msra.mxu0 %v3049_v63  ;;  %3014 = vmatpush3.bf16.msra.mxu1 %v3049_v63  ;;  %v1620_v53 = vadd.f32 %v1510_v47, %v1129_v12  ;;  %v1752_v54 = vrot.slane %v1656_v22, 4  ;;  %v1753_v55 = vrot.slane %v1657_v23, 4  ;;  %v1621_v56 = vadd.f32 %v1512_v52, %v1130_v18  ;;  %v374_v63 = vld [vmem:[%s3147_s8 + $0x68] sm:$0x3] }
  0x29   : > { %2966 = vmatprep.subr.bf16.mxu0 %v3050_v3  ;;  %3007 = vmatprep.subr.bf16.mxu1 %v3050_v3  ;;  %v1755_v57 = vrot.slane %v1658_v46, 4  ;;  %v1998_v59 = vsel %vm1507_vm1, %v1996_v37, %v1997_v48  ;;  %v2000_v60 = vsel %vm1507_vm1, %v1997_v48, %v1999_v49  ;;  %v3303_v1 = vunpack.c.h.bf16 %v2910_v51 }
  0x2a   : > { %v1754_v61 = vsel %vm1507_vm1, %v1752_v54, %v1753_v55  ;;  %v2108_v62 = vadd.f32 %v1998_v59, %v1620_v53  ;;  %v2109_v5 = vadd.f32 %v2000_v60, %v1621_v56  ;;  %v462_v10 = vmul.f32 %v3262_v32, %v3180_v24 }
  0x2b   : > { %v1756_v2 = vsel %vm1507_vm1, %v1753_v55, %v1755_v57  ;;  %v1864_v4 = vadd.f32 %v1754_v61, %v1375_v31  ;;  %v463_v12 = vmul.f32 %v3282_v45, %v3180_v24  ;;  %v534_v16 = vmul.f32 %v3284_v14, %v3183_v25 }
  0x2c   : > { %2967 = vmatpush3.bf16.msra.mxu0 %v3050_v3  ;;  %3015 = vmatpush3.bf16.msra.mxu1 %v3050_v3  ;;  %v1865_v11 = vadd.f32 %v1756_v2, %v1376_v34  ;;  %v535_v17 = vmul.f32 %v3293_v50, %v3183_v25  ;;  %v606_v28 = vmul.f32 %v3301_v0, %v3186_v26  ;;  %v3320_v33 = vunpack.c.l.bf16 %v374_v63 }
  0x2d   : > { %v2140_v18 = vadd.f32 %v2108_v62, %v1864_v4  ;;  %v607_v31 = vmul.f32 %v3303_v1, %v3186_v26  ;;  %v3322_v34 = vunpack.c.l.bf16 %v380_v6  ;;  %v3324_v35 = vunpack.c.l.bf16 %v386_v7 }
  0x2e   : > { %4422 = vst [vmem:[#allocation4_spill] sm:$0xff] %v3320_v33  ;;  %v2141_v3 = vadd.f32 %v2109_v5, %v1865_v11  ;;  %v698_v36 = vmul.f32 %v3262_v32, %v3196_v30  ;;  %v638_v37 = vadd.f32 %v606_v28, %v462_v10  ;;  %v699_v40 = vmul.f32 %v3282_v45, %v3196_v30 }
  0x2f   : > { %4423 = vst [vmem:[#allocation5_spill] sm:$0xff] %v3322_v34  ;;  %v639_v38 = vadd.f32 %v607_v31, %v463_v12  ;;  %v700_v41 = vmul.f32 %v3196_v30, %v3320_v33  ;;  %v945_v9 = vmul.f32 %v3284_v14, %v3220_v42  ;;  %v946_v22 = vmul.f32 %v3293_v50, %v3220_v42 }
  0x30   : > { %v2172_v44 = vpack.c.bf16 %v2141_v3, %v2140_v18  ;;  %v811_v13 = vrot.slane %v698_v36, 2  ;;  %v812_v23 = vrot.slane %v699_v40, 2  ;;  %v947_v47 = vmul.f32 %v3220_v42, %v3322_v34 }
  0x31   : > { %v814_v46 = vrot.slane %v700_v41, 2  ;;  %v1191_v48 = vmul.f32 %v3301_v0, %v3223_v43  ;;  %v1057_v49 = vrot.slane %v945_v9, 2  ;;  %v1058_v51 = vrot.slane %v946_v22, 2 }
  0x32   : > { %2968 = vmatprep.mubr.bf16.mxu0 %v2172_v44  ;;  %v1192_v52 = vmul.f32 %v3303_v1, %v3223_v43  ;;  %v1193_v53 = vmul.f32 %v3223_v43, %v3324_v35  ;;  %v813_v54 = vsel %vm770_vm0, %v811_v13, %v812_v23  ;;  %v1060_v56 = vrot.slane %v947_v47, 2  ;;  %v351_v44 = vld [vmem:[%s3147_s8 + $0xc] sm:$0xff]  }
  0x33   : > { %v815_v55 = vsel %vm770_vm0, %v812_v23, %v814_v46  ;;  %v1303_v57 = vrot.slane %v1191_v48, 2  ;;  %v899_v59 = vadd.f32 %v813_v54, %v534_v16  ;;  %v1059_v61 = vsel %vm770_vm0, %v1057_v49, %v1058_v51  ;;  %v357_v46 = vld [vmem:[%s3147_s8 + $0x24] sm:$0xff]  }
  0x34   : > { %v900_v60 = vadd.f32 %v815_v55, %v535_v17  ;;  %v1304_v62 = vrot.slane %v1192_v52, 2  ;;  %v1061_v63 = vsel %vm770_vm0, %v1058_v51, %v1060_v56  ;;  %v1145_v2 = vadd.f32 %v1059_v61, %v638_v37  ;;  %v363_v55 = vld [vmem:[%s3147_s8 + $0x3c] sm:$0xff]  }
  0x35   : > { %v1306_v4 = vrot.slane %v1193_v53, 2  ;;  %v1435_v5 = vmul.f32 %v3262_v32, %v3254_v8  ;;  %v1146_v6 = vadd.f32 %v1061_v63, %v639_v38  ;;  %v1436_v10 = vmul.f32 %v3282_v45, %v3254_v8 }
  0x36   : > { %v1305_v7 = vsel %vm770_vm0, %v1303_v57, %v1304_v62  ;;  %v1437_v11 = vmul.f32 %v3254_v8, %v3320_v33  ;;  %v1680_v18 = vmul.f32 %v3284_v14, %v3276_v39  ;;  %v1681_v36 = vmul.f32 %v3293_v50, %v3276_v39 }
  0x37   : > { %v1307_v12 = vsel %vm770_vm0, %v1304_v62, %v1306_v4  ;;  %v1391_v16 = vadd.f32 %v1305_v7, %v899_v59  ;;  %v1548_v17 = vrot.slane %v1435_v5, 4  ;;  %v1549_v31 = vrot.slane %v1436_v10, 4  ;;  %v353_v7 = vld [vmem:[%s3147_s8 + $0x14] sm:$0x3]  ;;  %v359_v10 = vld [vmem:[%s3147_s8 + $0x2c] sm:$0x3] }
  0x38   : > { %v1392_v28 = vadd.f32 %v1307_v12, %v900_v60  ;;  %v1551_v3 = vrot.slane %v1437_v11, 4  ;;  %v1682_v37 = vmul.f32 %v3276_v39, %v3322_v34  ;;  %v1792_v38 = vrot.slane %v1680_v18, 4  ;;  %v365_v11 = vld [vmem:[%s3147_s8 + $0x44] sm:$0x3] }
  0x39   : > { %v1924_v40 = vmul.f32 %v3301_v0, %v3245_v58  ;;  %v1925_v41 = vmul.f32 %v3303_v1, %v3245_v58  ;;  %v1550_v13 = vsel %vm1507_vm1, %v1548_v17, %v1549_v31  ;;  %v1793_v22 = vrot.slane %v1681_v36, 4 }
  0x3a   : > { %v1552_v9 = vsel %vm1507_vm1, %v1549_v31, %v1551_v3  ;;  %v1926_v23 = vmul.f32 %v3245_v58, %v3324_v35  ;;  %v1636_v47 = vadd.f32 %v1550_v13, %v1145_v2  ;;  %v1795_v49 = vrot.slane %v1682_v37, 4 }
  0x3b   : > { %v1637_v48 = vadd.f32 %v1552_v9, %v1146_v6  ;;  %v2036_v51 = vrot.slane %v1924_v40, 4  ;;  %v1794_v52 = vsel %vm1507_vm1, %v1792_v38, %v1793_v22  ;;  %v2037_v53 = vrot.slane %v1925_v41, 4 }
  0x3c   : > { %v2039_v54 = vrot.slane %v1926_v23, 4  ;;  %v412_v56 = vunpack.c.l.bf16 %v351_v44  ;;  %v1796_v57 = vsel %vm1507_vm1, %v1793_v22, %v1795_v49  ;;  %v1880_v59 = vadd.f32 %v1794_v52, %v1391_v16 }
  0x3d   : > { %v413_v60 = vunpack.c.h.bf16 %v351_v44  ;;  %v3375_v61 = vunpack.c.l.bf16 %v357_v46  ;;  %v1881_v62 = vadd.f32 %v1796_v57, %v1392_v28  ;;  %v2038_v63 = vsel %vm1507_vm1, %v2036_v51, %v2037_v53 }
  0x3e   : > { %v2040_v2 = vsel %vm1507_vm1, %v2037_v53, %v2039_v54  ;;  %v3379_v4 = vunpack.c.h.bf16 %v357_v46  ;;  %v2124_v5 = vadd.f32 %v2038_v63, %v1636_v47  ;;  %v3384_v12 = vunpack.c.l.bf16 %v363_v55 }
  0x3f   : > { %v2125_v6 = vadd.f32 %v2040_v2, %v1637_v48  ;;  %v3386_v17 = vunpack.c.h.bf16 %v363_v55  ;;  %v448_v16 = vmul.f32 %v3180_v24, %v412_v56  ;;  %v449_v18 = vmul.f32 %v3180_v24, %v413_v60 }
  0x40   : > { %v520_v28 = vmul.f32 %v3183_v25, %v3375_v61  ;;  %v521_v31 = vmul.f32 %v3183_v25, %v3379_v4  ;;  %v2156_v3 = vadd.f32 %v2124_v5, %v1880_v59  ;;  %v592_v37 = vmul.f32 %v3186_v26, %v3384_v12 }
  0x41   : > { %v2157_v36 = vadd.f32 %v2125_v6, %v1881_v62  ;;  %v593_v38 = vmul.f32 %v3186_v26, %v3386_v17  ;;  %v655_v40 = vunpack.c.l.bf16 %v353_v7  ;;  %v3398_v41 = vunpack.c.l.bf16 %v359_v10 }
  0x42   : > { %v3400_v44 = vunpack.c.l.bf16 %v365_v11  ;;  %v677_v13 = vmul.f32 %v3196_v30, %v412_v56  ;;  %v624_v22 = vadd.f32 %v592_v37, %v448_v16  ;;  %v678_v46 = vmul.f32 %v3196_v30, %v413_v60 }
  0x43   : > { %v2180_v9 = vpack.c.bf16 %v2157_v36, %v2156_v3  ;;  %v625_v23 = vadd.f32 %v593_v38, %v449_v18  ;;  %v679_v47 = vmul.f32 %v3196_v30, %v655_v40  ;;  %v924_v49 = vmul.f32 %v3220_v42, %v3375_v61 }
  0x44   : > { %v776_v48 = vrot.slane %v677_v13, 2  ;;  %v925_v51 = vmul.f32 %v3220_v42, %v3379_v4  ;;  %v777_v52 = vrot.slane %v678_v46, 2  ;;  %v926_v53 = vmul.f32 %v3220_v42, %v3398_v41 }
  0x45   : > { %2984 = vmatprep.mubr.bf16.mxu1 %v2180_v9  ;;  %v1170_v54 = vmul.f32 %v3223_v43, %v3384_v12  ;;  %v1171_v55 = vmul.f32 %v3223_v43, %v3386_v17  ;;  %v779_v57 = vrot.slane %v679_v47, 2  ;;  %v1022_v59 = vrot.slane %v924_v49, 2 }
  0x46   : > { %v1023_v62 = vrot.slane %v925_v51, 2  ;;  %v1172_v63 = vmul.f32 %v3223_v43, %v3400_v44  ;;  %v778_v2 = vsel %vm770_vm0, %v776_v48, %v777_v52  ;;  %v1025_v5 = vrot.slane %v926_v53, 2 }
  0x47   : > { %v1268_v6 = vrot.slane %v1170_v54, 2  ;;  %v1269_v7 = vrot.slane %v1171_v55, 2  ;;  %v780_v10 = vsel %vm770_vm0, %v777_v52, %v779_v57  ;;  %v885_v11 = vadd.f32 %v778_v2, %v520_v28 }
  0x48   : > { %v1024_v16 = vsel %vm770_vm0, %v1022_v59, %v1023_v62  ;;  %v1271_v18 = vrot.slane %v1172_v63, 2  ;;  %v886_v3 = vadd.f32 %v780_v10, %v521_v31  ;;  %v1026_v36 = vsel %vm770_vm0, %v1023_v62, %v1025_v5 }
  0x49   : > { %v1131_v37 = vadd.f32 %v1024_v16, %v624_v22  ;;  %v1270_v38 = vsel %vm770_vm0, %v1268_v6, %v1269_v7  ;;  %v1132_v13 = vadd.f32 %v1026_v36, %v625_v23  ;;  %v1414_v47 = vmul.f32 %v3254_v8, %v412_v56  ;;  %v375_v56 = vld [vmem:[%s3147_s8 + $0x6c] sm:$0xff]   ;;  %v381_v6 = vld [vmem:[%s3147_s8 + $0x84] sm:$0xff]  }
  0x4a   : > { %v1272_v9 = vsel %vm770_vm0, %v1269_v7, %v1271_v18  ;;  %v1377_v46 = vadd.f32 %v1270_v38, %v885_v11  ;;  %v1415_v49 = vmul.f32 %v3254_v8, %v413_v60  ;;  %v1416_v28 = vmul.f32 %v3254_v8, %v655_v40 }
  0x4b   : > { %v1378_v48 = vadd.f32 %v1272_v9, %v886_v3  ;;  %v1659_v31 = vmul.f32 %v3276_v39, %v3375_v61  ;;  %v1513_v51 = vrot.slane %v1414_v47, 4  ;;  %v1660_v22 = vmul.f32 %v3276_v39, %v3379_v4  ;;  %v387_v3 = vld [vmem:[%s3147_s8 + $0x9c] sm:$0xff]  }
  0x4c   : > { %v1661_v23 = vmul.f32 %v3276_v39, %v3398_v41  ;;  %v1903_v52 = vmul.f32 %v3245_v58, %v3384_v12  ;;  %v1514_v53 = vrot.slane %v1415_v49, 4  ;;  %v1516_v54 = vrot.slane %v1416_v28, 4  ;;  %v377_v28 = vld [vmem:[%s3147_s8 + $0x74] sm:$0x3] }
  0x4d   : > { %v1757_v60 = vrot.slane %v1659_v31, 4  ;;  %v1904_v40 = vmul.f32 %v3245_v58, %v3386_v17  ;;  %v1758_v55 = vrot.slane %v1660_v22, 4  ;;  %v1905_v59 = vmul.f32 %v3245_v58, %v3400_v44 }
  0x4e   : > { %v1760_v57 = vrot.slane %v1661_v23, 4  ;;  %v2001_v62 = vrot.slane %v1903_v52, 4  ;;  %v1515_v63 = vsel %vm1507_vm1, %v1513_v51, %v1514_v53  ;;  %v1517_v2 = vsel %vm1507_vm1, %v1514_v53, %v1516_v54  ;;  %v389_v23 = vld [vmem:[%s3147_s8 + $0xa4] sm:$0x3] }
  0x4f   : > { %v2002_v5 = vrot.slane %v1904_v40, 4  ;;  %v3442_v7 = vunpack.c.l.bf16 %v375_v56  ;;  %v1622_v10 = vadd.f32 %v1515_v63, %v1131_v37  ;;  %v1623_v11 = vadd.f32 %v1517_v2, %v1132_v13  ;;  %v383_v13 = vld [vmem:[%s3147_s8 + $0x8c] sm:$0x3] }
  0x50   : > { %v1759_v16 = vsel %vm1507_vm1, %v1757_v60, %v1758_v55  ;;  %v1761_v18 = vsel %vm1507_vm1, %v1758_v55, %v1760_v57  ;;  %v2004_v47 = vrot.slane %v1905_v59, 4  ;;  %v3449_v31 = vunpack.c.h.bf16 %v375_v56 }
  0x51   : > { %4424 = vst [vmem:[#allocation6_spill] sm:$0xff] %v3442_v7  ;;  %v1866_v36 = vadd.f32 %v1759_v16, %v1377_v46  ;;  %v1867_v38 = vadd.f32 %v1761_v18, %v1378_v48  ;;  %v2003_v9 = vsel %vm1507_vm1, %v2001_v62, %v2002_v5  ;;  %v3451_v51 = vunpack.c.l.bf16 %v381_v6 }
  0x52   : > { %v2110_v49 = vadd.f32 %v2003_v9, %v1622_v10  ;;  %4425 = vst [vmem:[#allocation7_spill] sm:$0xff] %v3449_v31  ;;  %v3453_v22 = vunpack.c.h.bf16 %v381_v6  ;;  %v2005_v37 = vsel %vm1507_vm1, %v2002_v5, %v2004_v47  ;;  %v3458_v52 = vunpack.c.l.bf16 %v387_v3 }
  0x53   : > { %v3460_v53 = vunpack.c.h.bf16 %v387_v3  ;;  %v464_v46 = vmul.f32 %v3180_v24, %v3442_v7  ;;  %v2111_v48 = vadd.f32 %v2005_v37, %v1623_v11  ;;  %v465_v56 = vmul.f32 %v3180_v24, %v3449_v31 }
  0x54   : > { %v2142_v54 = vadd.f32 %v2110_v49, %v1866_v36  ;;  %v536_v60 = vmul.f32 %v3183_v25, %v3451_v51  ;;  %v537_v40 = vmul.f32 %v3183_v25, %v3453_v22  ;;  %v608_v55 = vmul.f32 %v3186_v26, %v3458_v52 }
  0x55   : > { %v609_v57 = vmul.f32 %v3186_v26, %v3460_v53  ;;  %v3474_v59 = vunpack.c.l.bf16 %v377_v28  ;;  %v2143_v62 = vadd.f32 %v2111_v48, %v1867_v38  ;;  %v3476_v63 = vunpack.c.l.bf16 %v383_v13 }
  0x56   : > { %v3478_v2 = vunpack.c.l.bf16 %v389_v23  ;;  %v701_v5 = vmul.f32 %v3196_v30, %v3442_v7  ;;  %v640_v6 = vadd.f32 %v608_v55, %v464_v46  ;;  %v702_v11 = vmul.f32 %v3196_v30, %v3449_v31 }
  0x57   : > { %4426 = vst [vmem:[#allocation8_spill] sm:$0xff] %v3474_v59  ;;  %4427 = vst [vmem:[#allocation9_spill] sm:$0xff] %v3476_v63  ;;  %v641_v10 = vadd.f32 %v609_v57, %v465_v56  ;;  %v703_v16 = vmul.f32 %v3196_v30, %v3474_v59  ;;  %v2173_v18 = vpack.c.bf16 %v2143_v62, %v2142_v54 }
  0x58   : > { %v816_v3 = vrot.slane %v701_v5, 2  ;;  %v948_v36 = vmul.f32 %v3220_v42, %v3451_v51  ;;  %v949_v38 = vmul.f32 %v3220_v42, %v3453_v22  ;;  %v817_v9 = vrot.slane %v702_v11, 2 }
  0x59   : > { %v819_v47 = vrot.slane %v703_v16, 2  ;;  %v950_v49 = vmul.f32 %v3220_v42, %v3476_v63  ;;  %v1194_v28 = vmul.f32 %v3223_v43, %v3458_v52  ;;  %2969 = vmatmul.mubr.bf16.vlgmr.msra.gmra.mrb[0].mxu0 %v2173_v18  ;;  %v1195_v23 = vmul.f32 %v3223_v43, %v3460_v53 }
  0x5a   : > { %v1062_v37 = vrot.slane %v948_v36, 2  ;;  %v1063_v13 = vrot.slane %v949_v38, 2  ;;  %v1196_v46 = vmul.f32 %v3223_v43, %v3478_v2  ;;  %v818_v48 = vsel %vm770_vm0, %v816_v3, %v817_v9 }
  0x5b   : > { %v820_v54 = vsel %vm770_vm0, %v817_v9, %v819_v47  ;;  %v1065_v56 = vrot.slane %v950_v49, 2  ;;  %v1308_v55 = vrot.slane %v1194_v28, 2  ;;  %v901_v57 = vadd.f32 %v818_v48, %v536_v60 }
  0x5c   : > { %v902_v62 = vadd.f32 %v820_v54, %v537_v40  ;;  %v1064_v5 = vsel %vm770_vm0, %v1062_v37, %v1063_v13  ;;  %v1309_v11 = vrot.slane %v1195_v23, 2  ;;  %v1311_v36 = vrot.slane %v1196_v46, 2 }
  0x5d   : > { %v1066_v16 = vsel %vm770_vm0, %v1063_v13, %v1065_v56  ;;  %v1147_v18 = vadd.f32 %v1064_v5, %v640_v6  ;;  %v1438_v38 = vmul.f32 %v3254_v8, %v3442_v7  ;;  %v1439_v9 = vmul.f32 %v3254_v8, %v3449_v31  ;;  %v2907_v56 = vld [vmem:[%s3147_s8 + $0x48] sm:$0xff]  }
  0x5e   : > { %v1148_v33 = vadd.f32 %v1066_v16, %v641_v10  ;;  %v1310_v3 = vsel %vm770_vm0, %v1308_v55, %v1309_v11  ;;  %v1440_v60 = vmul.f32 %v3254_v8, %v3474_v59  ;;  %v1312_v40 = vsel %vm770_vm0, %v1309_v11, %v1311_v36 }
  0x5f   : > { %v1393_v47 = vadd.f32 %v1310_v3, %v901_v57  ;;  %v1553_v49 = vrot.slane %v1438_v38, 4  ;;  %v1683_v6 = vmul.f32 %v3276_v39, %v3451_v51  ;;  %v1394_v28 = vadd.f32 %v1312_v40, %v902_v62 }
  0x60   : > { %v1554_v37 = vrot.slane %v1439_v9, 4  ;;  %v1556_v13 = vrot.slane %v1440_v60, 4  ;;  %v1684_v10 = vmul.f32 %v3276_v39, %v3453_v22  ;;  %v1685_v23 = vmul.f32 %v3276_v39, %v3476_v63 }
  0x61   : > { %v1797_v46 = vrot.slane %v1683_v6, 4  ;;  %v1927_v48 = vmul.f32 %v3245_v58, %v3458_v52  ;;  %v1928_v54 = vmul.f32 %v3245_v58, %v3460_v53  ;;  %v1929_v5 = vmul.f32 %v3245_v58, %v3478_v2 }
  0x62   : > { %v1555_v55 = vsel %vm1507_vm1, %v1553_v49, %v1554_v37  ;;  %v1557_v57 = vsel %vm1507_vm1, %v1554_v37, %v1556_v13  ;;  %v1798_v62 = vrot.slane %v1684_v10, 4  ;;  %v1800_v36 = vrot.slane %v1685_v23, 4  ;;  %v368_v37 = vld [vmem:[%s3147_s8 + $0x50] sm:$0x3] }
  0x63   : > { %v1638_v11 = vadd.f32 %v1555_v55, %v1147_v18  ;;  %v1639_v16 = vadd.f32 %v1557_v57, %v1148_v33  ;;  %v2041_v38 = vrot.slane %v1927_v48, 4  ;;  %v2042_v9 = vrot.slane %v1928_v54, 4 }
  0x64   : > { %v1799_v3 = vsel %vm1507_vm1, %v1797_v46, %v1798_v62  ;;  %v2044_v60 = vrot.slane %v1929_v5, 4  ;;  %v3526_v40 = vunpack.c.l.bf16 %v2907_v56  ;;  %v1801_v6 = vsel %vm1507_vm1, %v1798_v62, %v1800_v36 }
  0x65   : > { %v1882_v59 = vadd.f32 %v1799_v3, %v1393_v47  ;;  %v3529_v49 = vunpack.c.h.bf16 %v2907_v56  ;;  %v450_v13 = vmul.f32 %v3162_v15, %v3180_v24  ;;  %v1883_v10 = vadd.f32 %v1801_v6, %v1394_v28 }
  0x66   : > { %v2043_v33 = vsel %vm1507_vm1, %v2041_v38, %v2042_v9  ;;  %v2045_v18 = vsel %vm1507_vm1, %v2042_v9, %v2044_v60  ;;  %v451_v23 = vmul.f32 %v3167_v19, %v3180_v24  ;;  %v522_v54 = vmul.f32 %v3169_v20, %v3183_v25 }
  0x67   : > { %v2126_v46 = vadd.f32 %v2043_v33, %v1638_v11  ;;  %v2127_v48 = vadd.f32 %v2045_v18, %v1639_v16  ;;  %v523_v47 = vmul.f32 %v3171_v21, %v3183_v25  ;;  %v594_v56 = vmul.f32 %v3526_v40, %v3186_v26 }
  0x68   : > { %v595_v28 = vmul.f32 %v3529_v49, %v3186_v26  ;;  %v3546_v55 = vunpack.c.l.bf16 %v368_v37  ;;  %v680_v57 = vmul.f32 %v3162_v15, %v3196_v30  ;;  %v681_v11 = vmul.f32 %v3167_v19, %v3196_v30 }
  0x69   : > { %v2158_v62 = vadd.f32 %v2126_v46, %v1882_v59  ;;  %v2159_v5 = vadd.f32 %v2127_v48, %v1883_v10  ;;  %v682_v16 = vmul.f32 %v3196_v30, %v3188_v27  ;;  %v626_v36 = vadd.f32 %v594_v56, %v450_v13 }
  0x6a   : > { %v627_v38 = vadd.f32 %v595_v28, %v451_v23  ;;  %v781_v3 = vrot.slane %v680_v57, 2  ;;  %v927_v9 = vmul.f32 %v3169_v20, %v3220_v42  ;;  %v782_v6 = vrot.slane %v681_v11, 2 }
  0x6b   : > { %v2181_v60 = vpack.c.bf16 %v2159_v5, %v2158_v62  ;;  %v784_v37 = vrot.slane %v682_v16, 2  ;;  %v928_v33 = vmul.f32 %v3171_v21, %v3220_v42  ;;  %v929_v59 = vmul.f32 %v3220_v42, %v3193_v29 }
  0x6c   : > { %v1027_v10 = vrot.slane %v927_v9, 2  ;;  %v1173_v18 = vmul.f32 %v3526_v40, %v3223_v43  ;;  %v1174_v13 = vmul.f32 %v3529_v49, %v3223_v43  ;;  %v783_v23 = vsel %vm770_vm0, %v781_v3, %v782_v6 }
  0x6d   : > { %2985 = vmatmul.mubr.bf16.vlgmr.msra.gmra.mrb[0].mxu1 %v2181_v60  ;;  %v785_v46 = vsel %vm770_vm0, %v782_v6, %v784_v37  ;;  %v1028_v48 = vrot.slane %v928_v33, 2  ;;  %v1175_v56 = vmul.f32 %v3223_v43, %v3546_v55  ;;  %v887_v28 = vadd.f32 %v783_v23, %v522_v54 }
  0x6e   : > { %v888_v57 = vadd.f32 %v785_v46, %v523_v47  ;;  %v1030_v62 = vrot.slane %v929_v59, 2  ;;  %v1273_v5 = vrot.slane %v1173_v18, 2  ;;  %v1274_v16 = vrot.slane %v1174_v13, 2 }
  0x6f   : > { %v1029_v11 = vsel %vm770_vm0, %v1027_v10, %v1028_v48  ;;  %v1276_v9 = vrot.slane %v1175_v56, 2  ;;  %v1417_v31 = vmul.f32 %v3162_v15, %v3254_v8  ;;  %v1418_v6 = vmul.f32 %v3167_v19, %v3254_v8  ;;  %v2911_v56 = vld [vmem:[%s3147_s8 + $0xa8] sm:$0xff]  }
  0x70   : > { %v1031_v60 = vsel %vm770_vm0, %v1028_v48, %v1030_v62  ;;  %v1133_v3 = vadd.f32 %v1029_v11, %v626_v36  ;;  %v1419_v37 = vmul.f32 %v3254_v8, %v3188_v27  ;;  %v1275_v47 = vsel %vm770_vm0, %v1273_v5, %v1274_v16 }
  0x71   : > { %v1134_v54 = vadd.f32 %v1031_v60, %v627_v38  ;;  %v1277_v33 = vsel %vm770_vm0, %v1274_v16, %v1276_v9  ;;  %v1518_v59 = vrot.slane %v1417_v31, 4  ;;  %v1379_v10 = vadd.f32 %v1275_v47, %v887_v28 }
  0x72   : > { %v1380_v18 = vadd.f32 %v1277_v33, %v888_v57  ;;  %v1519_v13 = vrot.slane %v1418_v6, 4  ;;  %v1521_v15 = vrot.slane %v1419_v37, 4  ;;  %v1662_v36 = vmul.f32 %v3169_v20, %v3276_v39 }
  0x73   : > { %v1663_v19 = vmul.f32 %v3171_v21, %v3276_v39  ;;  %v1664_v27 = vmul.f32 %v3276_v39, %v3193_v29  ;;  %v1906_v38 = vmul.f32 %v3526_v40, %v3245_v58  ;;  %v1907_v46 = vmul.f32 %v3529_v49, %v3245_v58 }
  0x74   : > { %v1520_v23 = vsel %vm1507_vm1, %v1518_v59, %v1519_v13  ;;  %v1522_v31 = vsel %vm1507_vm1, %v1519_v13, %v1521_v15  ;;  %v1908_v48 = vmul.f32 %v3245_v58, %v3546_v55  ;;  %v1762_v62 = vrot.slane %v1662_v36, 4  ;;  %v392_v15 = vld [vmem:[%s3147_s8 + $0xb0] sm:$0x3] }
  0x75   : > { %v1624_v28 = vadd.f32 %v1520_v23, %v1133_v3  ;;  %v1625_v57 = vadd.f32 %v1522_v31, %v1134_v54  ;;  %v1763_v5 = vrot.slane %v1663_v19, 4  ;;  %v1765_v11 = vrot.slane %v1664_v27, 4 }
  0x76   : > { %v2006_v16 = vrot.slane %v1906_v38, 4  ;;  %v2007_v9 = vrot.slane %v1907_v46, 4  ;;  %v2009_v60 = vrot.slane %v1908_v48, 4  ;;  %v3594_v37 = vunpack.c.l.bf16 %v2911_v56 }
  0x77   : > { %v1764_v6 = vsel %vm1507_vm1, %v1762_v62, %v1763_v5  ;;  %v3596_v47 = vunpack.c.h.bf16 %v2911_v56  ;;  %v466_v33 = vmul.f32 %v3284_v14, %v3180_v24  ;;  %v1766_v59 = vsel %vm1507_vm1, %v1763_v5, %v1765_v11 }
  0x78   : > { %v1868_v3 = vadd.f32 %v1764_v6, %v1379_v10  ;;  %v2008_v54 = vsel %vm1507_vm1, %v2006_v16, %v2007_v9  ;;  %v2010_v13 = vsel %vm1507_vm1, %v2007_v9, %v2009_v60  ;;  %v1869_v36 = vadd.f32 %v1766_v59, %v1380_v18 }
  0x79   : > { %v2112_v19 = vadd.f32 %v2008_v54, %v1624_v28  ;;  %v2113_v27 = vadd.f32 %v2010_v13, %v1625_v57  ;;  %v467_v38 = vmul.f32 %v3293_v50, %v3180_v24  ;;  %v538_v23 = vmul.f32 %v3301_v0, %v3183_v25 }
  0x7a   : > { %v539_v31 = vmul.f32 %v3303_v1, %v3183_v25  ;;  %v610_v10 = vmul.f32 %v3594_v37, %v3186_v26  ;;  %v611_v46 = vmul.f32 %v3596_v47, %v3186_v26  ;;  %v3614_v18 = vunpack.c.l.bf16 %v392_v15 }
  0x7b   : > { %v2144_v48 = vadd.f32 %v2112_v19, %v1868_v3  ;;  %v2145_v56 = vadd.f32 %v2113_v27, %v1869_v36  ;;  %v704_v28 = vmul.f32 %v3284_v14, %v3196_v30  ;;  %v705_v5 = vmul.f32 %v3293_v50, %v3196_v30 }
  0x7c   : > { %v642_v57 = vadd.f32 %v610_v10, %v466_v33  ;;  %v643_v62 = vadd.f32 %v611_v46, %v467_v38  ;;  %v706_v11 = vmul.f32 %v3196_v30, %v3322_v34  ;;  %v951_v60 = vmul.f32 %v3301_v0, %v3220_v42 }
  0x7d   : > { %v2174_v16 = vpack.c.bf16 %v2145_v56, %v2144_v48  ;;  %v821_v9 = vrot.slane %v704_v28, 2  ;;  %v952_v6 = vmul.f32 %v3303_v1, %v3220_v42  ;;  %v822_v59 = vrot.slane %v705_v5, 2 }
  0x7e   : > { %v824_v3 = vrot.slane %v706_v11, 2  ;;  %v953_v33 = vmul.f32 %v3220_v42, %v3324_v35  ;;  %v1197_v54 = vmul.f32 %v3594_v37, %v3223_v43  ;;  %v1067_v13 = vrot.slane %v951_v60, 2 }
  0x7f   : > { %2972 = vmatprep.mubr.bf16.mxu0 %v2174_v16  ;;  %v1068_v15 = vrot.slane %v952_v6, 2  ;;  %v1198_v36 = vmul.f32 %v3596_v47, %v3223_v43  ;;  %v1199_v19 = vmul.f32 %v3223_v43, %v3614_v18  ;;  %v823_v27 = vsel %vm770_vm0, %v821_v9, %v822_v59 }
  0x80   : > { %v825_v38 = vsel %vm770_vm0, %v822_v59, %v824_v3  ;;  %v1070_v10 = vrot.slane %v953_v33, 2  ;;  %v1313_v46 = vrot.slane %v1197_v54, 2  ;;  %v903_v48 = vadd.f32 %v823_v27, %v538_v23 }
  0x81   : > { %v904_v56 = vadd.f32 %v825_v38, %v539_v31  ;;  %v1069_v28 = vsel %vm770_vm0, %v1067_v13, %v1068_v15  ;;  %v1314_v5 = vrot.slane %v1198_v36, 2  ;;  %v1316_v60 = vrot.slane %v1199_v19, 2 }
  0x82   : > { %v1071_v11 = vsel %vm770_vm0, %v1068_v15, %v1070_v10  ;;  %v1149_v16 = vadd.f32 %v1069_v28, %v642_v57  ;;  %v1441_v6 = vmul.f32 %v3284_v14, %v3254_v8  ;;  %v1442_v59 = vmul.f32 %v3293_v50, %v3254_v8  ;;  %v369_v10 = vld [vmem:[%s3147_s8 + $0x54] sm:$0xff]  }
  0x83   : > { %v1150_v7 = vadd.f32 %v1071_v11, %v643_v62  ;;  %v1315_v9 = vsel %vm770_vm0, %v1313_v46, %v1314_v5  ;;  %v1443_v23 = vmul.f32 %v3254_v8, %v3322_v34  ;;  %v1317_v31 = vsel %vm770_vm0, %v1314_v5, %v1316_v60 }
  0x84   : > { %v1395_v3 = vadd.f32 %v1315_v9, %v903_v48  ;;  %v1558_v33 = vrot.slane %v1441_v6, 4  ;;  %v1686_v57 = vmul.f32 %v3301_v0, %v3276_v39  ;;  %v1396_v54 = vadd.f32 %v1317_v31, %v904_v56 }
  0x85   : > { %v1559_v13 = vrot.slane %v1442_v59, 4  ;;  %v1561_v15 = vrot.slane %v1443_v23, 4  ;;  %v1687_v62 = vmul.f32 %v3303_v1, %v3276_v39  ;;  %v1688_v36 = vmul.f32 %v3276_v39, %v3324_v35 }
  0x86   : > { %v1802_v19 = vrot.slane %v1686_v57, 4  ;;  %v1930_v27 = vmul.f32 %v3594_v37, %v3245_v58  ;;  %v1931_v38 = vmul.f32 %v3596_v47, %v3245_v58  ;;  %v1932_v28 = vmul.f32 %v3245_v58, %v3614_v18 }
  0x87   : > { %v1560_v46 = vsel %vm1507_vm1, %v1558_v33, %v1559_v13  ;;  %v1562_v48 = vsel %vm1507_vm1, %v1559_v13, %v1561_v15  ;;  %v1803_v56 = vrot.slane %v1687_v62, 4  ;;  %v1805_v60 = vrot.slane %v1688_v36, 4  ;;  %v371_v33 = vld [vmem:[%s3147_s8 + $0x5c] sm:$0x3] }
  0x88   : > { %v1640_v5 = vadd.f32 %v1560_v46, %v1149_v16  ;;  %v1641_v11 = vadd.f32 %v1562_v48, %v1150_v7  ;;  %v2046_v6 = vrot.slane %v1930_v27, 4  ;;  %v2047_v59 = vrot.slane %v1931_v38, 4 }
  0x89   : > { %v1804_v9 = vsel %vm1507_vm1, %v1802_v19, %v1803_v56  ;;  %v2049_v23 = vrot.slane %v1932_v28, 4  ;;  %v3662_v31 = vunpack.c.l.bf16 %v369_v10  ;;  %v1806_v57 = vsel %vm1507_vm1, %v1803_v56, %v1805_v60 }
  0x8a   : > { %v1884_v34 = vadd.f32 %v1804_v9, %v1395_v3  ;;  %v3666_v50 = vunpack.c.h.bf16 %v369_v10  ;;  %v452_v13 = vmul.f32 %v3180_v24, %v3375_v61  ;;  %v1885_v58 = vadd.f32 %v1806_v57, %v1396_v54 }
  0x8b   : > { %v2048_v7 = vsel %vm1507_vm1, %v2046_v6, %v2047_v59  ;;  %v2050_v16 = vsel %vm1507_vm1, %v2047_v59, %v2049_v23  ;;  %v453_v15 = vmul.f32 %v3180_v24, %v3379_v4  ;;  %v524_v19 = vmul.f32 %v3183_v25, %v3384_v12 }
  0x8c   : > { %v2128_v62 = vadd.f32 %v2048_v7, %v1640_v5  ;;  %v2129_v36 = vadd.f32 %v2050_v16, %v1641_v11  ;;  %v525_v3 = vmul.f32 %v3183_v25, %v3386_v17  ;;  %v596_v27 = vmul.f32 %v3186_v26, %v3662_v31 }
  0x8d   : > { %v597_v54 = vmul.f32 %v3186_v26, %v3666_v50  ;;  %v3682_v38 = vunpack.c.l.bf16 %v371_v33  ;;  %v683_v10 = vmul.f32 %v3196_v30, %v3375_v61  ;;  %v684_v56 = vmul.f32 %v3196_v30, %v3379_v4 }
  0x8e   : > { %v2160_v46 = vadd.f32 %v2128_v62, %v1884_v34  ;;  %v2161_v48 = vadd.f32 %v2129_v36, %v1885_v58  ;;  %v685_v28 = vmul.f32 %v3196_v30, %v3398_v41  ;;  %v628_v5 = vadd.f32 %v596_v27, %v452_v13 }
  0x8f   : > { %4428 = vst [vmem:[#allocation10_spill] sm:$0xff] %v3682_v38  ;;  %v629_v11 = vadd.f32 %v597_v54, %v453_v15  ;;  %v786_v60 = vrot.slane %v683_v10, 2  ;;  %v930_v6 = vmul.f32 %v3220_v42, %v3384_v12  ;;  %v787_v59 = vrot.slane %v684_v56, 2 }
  0x90   : > { %v2182_v9 = vpack.c.bf16 %v2161_v48, %v2160_v46  ;;  %v789_v23 = vrot.slane %v685_v28, 2  ;;  %v931_v57 = vmul.f32 %v3220_v42, %v3386_v17  ;;  %v932_v34 = vmul.f32 %v3220_v42, %v3400_v44 }
  0x91   : > { %v1032_v33 = vrot.slane %v930_v6, 2  ;;  %v1176_v58 = vmul.f32 %v3223_v43, %v3662_v31  ;;  %v1177_v13 = vmul.f32 %v3223_v43, %v3666_v50  ;;  %v788_v7 = vsel %vm770_vm0, %v786_v60, %v787_v59 }
  0x92   : > { %2988 = vmatprep.mubr.bf16.mxu1 %v2182_v9  ;;  %v790_v16 = vsel %vm770_vm0, %v787_v59, %v789_v23  ;;  %v1033_v15 = vrot.slane %v931_v57, 2  ;;  %v1178_v62 = vmul.f32 %v3223_v43, %v3682_v38  ;;  %v889_v36 = vadd.f32 %v788_v7, %v524_v19 }
  0x93   : > { %v890_v27 = vadd.f32 %v790_v16, %v525_v3  ;;  %v1035_v54 = vrot.slane %v932_v34, 2  ;;  %v1278_v10 = vrot.slane %v1176_v58, 2  ;;  %v1279_v48 = vrot.slane %v1177_v13, 2 }
  0x94   : > { %v1034_v46 = vsel %vm770_vm0, %v1032_v33, %v1033_v15  ;;  %v1281_v56 = vrot.slane %v1178_v62, 2  ;;  %v1420_v28 = vmul.f32 %v3254_v8, %v3375_v61  ;;  %v1421_v9 = vmul.f32 %v3254_v8, %v3379_v4 }
  0x95   : > { %v1036_v6 = vsel %vm770_vm0, %v1033_v15, %v1035_v54  ;;  %v1135_v60 = vadd.f32 %v1034_v46, %v628_v5  ;;  %v1422_v59 = vmul.f32 %v3254_v8, %v3398_v41  ;;  %v1280_v3 = vsel %vm770_vm0, %v1278_v10, %v1279_v48 }
  0x96   : > { %v1136_v19 = vadd.f32 %v1036_v6, %v629_v11  ;;  %v1282_v23 = vsel %vm770_vm0, %v1279_v48, %v1281_v56  ;;  %v1523_v57 = vrot.slane %v1420_v28, 4  ;;  %v1381_v34 = vadd.f32 %v1280_v3, %v889_v36  ;;  %v3723_v11 = vld [vmem:[%s4398_s2 + $0x8] ss:$0 sm:$0xff]  ;;  %v393_v36 = vld [vmem:[%s3147_s8 + $0xb4] sm:$0xff]  }
  0x97   : > { %v1382_v33 = vadd.f32 %v1282_v23, %v890_v27  ;;  %v1524_v58 = vrot.slane %v1421_v9, 4  ;;  %v1526_v61 = vrot.slane %v1422_v59, 4  ;;  %v1665_v5 = vmul.f32 %v3276_v39, %v3384_v12 }
  0x98   : > { %v1666_v4 = vmul.f32 %v3276_v39, %v3386_v17  ;;  %v1667_v41 = vmul.f32 %v3276_v39, %v3400_v44  ;;  %v1909_v13 = vmul.f32 %v3723_v11, %v3662_v31  ;;  %v1910_v15 = vmul.f32 %v3723_v11, %v3666_v50 }
  0x99   : > { %v1525_v7 = vsel %vm1507_vm1, %v1523_v57, %v1524_v58  ;;  %v1527_v16 = vsel %vm1507_vm1, %v1524_v58, %v1526_v61  ;;  %v1911_v62 = vmul.f32 %v3723_v11, %v3682_v38  ;;  %v1767_v10 = vrot.slane %v1665_v5, 4  ;;  %v395_v61 = vld [vmem:[%s3147_s8 + $0xbc] sm:$0x3] }
  0x9a   : > { %v1626_v27 = vadd.f32 %v1525_v7, %v1135_v60  ;;  %v1627_v54 = vadd.f32 %v1527_v16, %v1136_v19  ;;  %v1768_v46 = vrot.slane %v1666_v4, 4  ;;  %v1770_v48 = vrot.slane %v1667_v41, 4 }
  0x9b   : > { %v2011_v56 = vrot.slane %v1909_v13, 4  ;;  %v2012_v28 = vrot.slane %v1910_v15, 4  ;;  %v2014_v6 = vrot.slane %v1911_v62, 4  ;;  %v3735_v59 = vunpack.c.l.bf16 %v393_v36 }
  0x9c   : > { %v1769_v9 = vsel %vm1507_vm1, %v1767_v10, %v1768_v46  ;;  %v3737_v3 = vunpack.c.h.bf16 %v393_v36  ;;  %v468_v23 = vmul.f32 %v3180_v24, %v3451_v51  ;;  %v1771_v57 = vsel %vm1507_vm1, %v1768_v46, %v1770_v48 }
  0x9d   : > { %v1870_v60 = vadd.f32 %v1769_v9, %v1381_v34  ;;  %v2013_v19 = vsel %vm1507_vm1, %v2011_v56, %v2012_v28  ;;  %v2015_v58 = vsel %vm1507_vm1, %v2012_v28, %v2014_v6  ;;  %v1871_v5 = vadd.f32 %v1771_v57, %v1382_v33 }
  0x9e   : > { %v2114_v4 = vadd.f32 %v2013_v19, %v1626_v27  ;;  %v2115_v41 = vadd.f32 %v2015_v58, %v1627_v54  ;;  %v469_v13 = vmul.f32 %v3180_v24, %v3453_v22  ;;  %v540_v7 = vmul.f32 %v3183_v25, %v3458_v52 }
  0x9f   : > { %v541_v16 = vmul.f32 %v3183_v25, %v3460_v53  ;;  %v612_v34 = vmul.f32 %v3186_v26, %v3735_v59  ;;  %v613_v15 = vmul.f32 %v3186_v26, %v3737_v3  ;;  %v3755_v33 = vunpack.c.l.bf16 %v395_v61 }
  0xa0   : > { %v2146_v62 = vadd.f32 %v2114_v4, %v1870_v60  ;;  %v2147_v36 = vadd.f32 %v2115_v41, %v1871_v5  ;;  %v707_v27 = vmul.f32 %v3196_v30, %v3451_v51  ;;  %v708_v46 = vmul.f32 %v3196_v30, %v3453_v22 }
  0xa1   : > { %v644_v54 = vadd.f32 %v612_v34, %v468_v23  ;;  %v645_v10 = vadd.f32 %v613_v15, %v469_v13  ;;  %v709_v48 = vmul.f32 %v3196_v30, %v3476_v63  ;;  %v954_v6 = vmul.f32 %v3220_v42, %v3458_v52 }
  0xa2   : > { %v2175_v56 = vpack.c.bf16 %v2147_v36, %v2146_v62  ;;  %v826_v28 = vrot.slane %v707_v27, 2  ;;  %v955_v9 = vmul.f32 %v3220_v42, %v3460_v53  ;;  %v827_v57 = vrot.slane %v708_v46, 2 }
  0xa3   : > { %v829_v60 = vrot.slane %v709_v48, 2  ;;  %v956_v23 = vmul.f32 %v3220_v42, %v3478_v2  ;;  %v1200_v19 = vmul.f32 %v3223_v43, %v3735_v59  ;;  %v1072_v58 = vrot.slane %v954_v6, 2 }
  0xa4   : > { %2973 = vmatmul.mubr.bf16.gmra.mrb[4].mxu0 %v2175_v56  ;;  %v1073_v61 = vrot.slane %v955_v9, 2  ;;  %v1201_v5 = vmul.f32 %v3223_v43, %v3737_v3  ;;  %v1202_v4 = vmul.f32 %v3223_v43, %v3755_v33  ;;  %v828_v41 = vsel %vm770_vm0, %v826_v28, %v827_v57 }
  0xa5   : > { %v830_v13 = vsel %vm770_vm0, %v827_v57, %v829_v60  ;;  %v1075_v34 = vrot.slane %v956_v23, 2  ;;  %v1318_v15 = vrot.slane %v1200_v19, 2  ;;  %v905_v62 = vadd.f32 %v828_v41, %v540_v7 }
  0xa6   : > { %v906_v36 = vadd.f32 %v830_v13, %v541_v16  ;;  %v1074_v27 = vsel %vm770_vm0, %v1072_v58, %v1073_v61  ;;  %v1319_v46 = vrot.slane %v1201_v5, 2  ;;  %v1321_v6 = vrot.slane %v1202_v4, 2 }
  0xa7   : > { %v1076_v48 = vsel %vm770_vm0, %v1073_v61, %v1075_v34  ;;  %v1151_v56 = vadd.f32 %v1074_v27, %v644_v54  ;;  %v1444_v9 = vmul.f32 %v3254_v8, %v3451_v51  ;;  %v1445_v28 = vmul.f32 %v3254_v8, %v3453_v22 }
  0xa8   : > { %v1152_v14 = vadd.f32 %v1076_v48, %v645_v10  ;;  %v1320_v38 = vsel %vm770_vm0, %v1318_v15, %v1319_v46  ;;  %v1446_v7 = vmul.f32 %v3254_v8, %v3476_v63  ;;  %v1322_v16 = vsel %vm770_vm0, %v1319_v46, %v1321_v6 }
  0xa9   : > { %v1397_v57 = vadd.f32 %v1320_v38, %v905_v62  ;;  %v1563_v60 = vrot.slane %v1444_v9, 4  ;;  %v1689_v54 = vmul.f32 %v3276_v39, %v3458_v52  ;;  %v1398_v23 = vadd.f32 %v1322_v16, %v906_v36 }
  0xaa   : > { %v1564_v19 = vrot.slane %v1445_v28, 4  ;;  %v1566_v58 = vrot.slane %v1446_v7, 4  ;;  %v1690_v10 = vmul.f32 %v3276_v39, %v3460_v53  ;;  %v1691_v61 = vmul.f32 %v3276_v39, %v3478_v2 }
  0xab   : > { %v1807_v5 = vrot.slane %v1689_v54, 4  ;;  %v1933_v4 = vmul.f32 %v3723_v11, %v3735_v59  ;;  %v1934_v38 = vmul.f32 %v3723_v11, %v3737_v3  ;;  %v1935_v15 = vmul.f32 %v3723_v11, %v3755_v33 }
  0xac   : > { %v1565_v41 = vsel %vm1507_vm1, %v1563_v60, %v1564_v19  ;;  %v1567_v13 = vsel %vm1507_vm1, %v1564_v19, %v1566_v58  ;;  %v1808_v34 = vrot.slane %v1690_v10, 4  ;;  %v1810_v27 = vrot.slane %v1691_v61, 4 }
  0xad   : > { %v1642_v62 = vadd.f32 %v1565_v41, %v1151_v56  ;;  %v1643_v36 = vadd.f32 %v1567_v13, %v1152_v14  ;;  %v2051_v46 = vrot.slane %v1933_v4, 4  ;;  %v2052_v6 = vrot.slane %v1934_v38, 4 }
  0xae   : > { %v1809_v48 = vsel %vm1507_vm1, %v1807_v5, %v1808_v34  ;;  %v2054_v9 = vrot.slane %v1935_v15, 4  ;;  %v454_v28 = vmul.f32 %v3169_v20, %v3180_v24  ;;  %v1811_v7 = vsel %vm1507_vm1, %v1808_v34, %v1810_v27 }
  0xaf   : > { %v1886_v16 = vadd.f32 %v1809_v48, %v1397_v57  ;;  %v455_v60 = vmul.f32 %v3171_v21, %v3180_v24  ;;  %v526_v54 = vmul.f32 %v3526_v40, %v3183_v25  ;;  %v1887_v56 = vadd.f32 %v1811_v7, %v1398_v23 }
  0xb0   : > { %v2053_v14 = vsel %vm1507_vm1, %v2051_v46, %v2052_v6  ;;  %v2055_v19 = vsel %vm1507_vm1, %v2052_v6, %v2054_v9  ;;  %v527_v58 = vmul.f32 %v3529_v49, %v3183_v25  ;;  %v598_v5 = vmul.f32 %v3262_v32, %v3186_v26 }
  0xb1   : > { %v2130_v10 = vadd.f32 %v2053_v14, %v1642_v62  ;;  %v2131_v61 = vadd.f32 %v2055_v19, %v1643_v36  ;;  %v599_v57 = vmul.f32 %v3282_v45, %v3186_v26  ;;  %v686_v4 = vmul.f32 %v3169_v20, %v3196_v30 }
  0xb2   : > { %v687_v23 = vmul.f32 %v3171_v21, %v3196_v30  ;;  %v688_v38 = vmul.f32 %v3196_v30, %v3193_v29  ;;  %v933_v41 = vmul.f32 %v3526_v40, %v3220_v42  ;;  %v630_v15 = vadd.f32 %v598_v5, %v454_v28  ;;  %v4429_v5 = vld [vmem:[#allocation4_spill] sm:$0xff] }
  0xb3   : > { %v2162_v13 = vadd.f32 %v2130_v10, %v1886_v16  ;;  %v2163_v34 = vadd.f32 %v2131_v61, %v1887_v56  ;;  %v631_v62 = vadd.f32 %v599_v57, %v455_v60  ;;  %v791_v36 = vrot.slane %v686_v4, 2 }
  0xb4   : > { %v792_v27 = vrot.slane %v687_v23, 2  ;;  %v794_v46 = vrot.slane %v688_v38, 2  ;;  %v934_v48 = vmul.f32 %v3529_v49, %v3220_v42  ;;  %v935_v9 = vmul.f32 %v3220_v42, %v3546_v55 }
  0xb5   : > { %v2183_v6 = vpack.c.bf16 %v2163_v34, %v2162_v13  ;;  %v1037_v7 = vrot.slane %v933_v41, 2  ;;  %v1179_v14 = vmul.f32 %v3262_v32, %v3223_v43  ;;  %v1180_v56 = vmul.f32 %v3282_v45, %v3223_v43 }
  0xb6   : > { %v793_v16 = vsel %vm770_vm0, %v791_v36, %v792_v27  ;;  %v795_v28 = vsel %vm770_vm0, %v792_v27, %v794_v46  ;;  %v1038_v60 = vrot.slane %v934_v48, 2  ;;  %v1040_v61 = vrot.slane %v935_v9, 2 }
  0xb7   : > { %2989 = vmatmul.mubr.bf16.gmra.mrb[4].mxu1 %v2183_v6  ;;  %v891_v19 = vadd.f32 %v793_v16, %v526_v54  ;;  %v892_v10 = vadd.f32 %v795_v28, %v527_v58  ;;  %v1181_v57 = vmul.f32 %v3223_v43, %v4429_v5  ;;  %v1283_v23 = vrot.slane %v1179_v14, 2 }
  0xb8   : > { %v1039_v4 = vsel %vm770_vm0, %v1037_v7, %v1038_v60  ;;  %v1284_v38 = vrot.slane %v1180_v56, 2  ;;  %v1423_v41 = vmul.f32 %v3169_v20, %v3254_v8  ;;  %v1041_v13 = vsel %vm770_vm0, %v1038_v60, %v1040_v61  ;;  %v2818_v56 = vld [vmem:[%s3851_s30] sm:$0xff]  }
  0xb9   : > { %v1137_v34 = vadd.f32 %v1039_v4, %v630_v15  ;;  %v1286_v36 = vrot.slane %v1181_v57, 2  ;;  %v1424_v54 = vmul.f32 %v3171_v21, %v3254_v8  ;;  %v1138_v58 = vadd.f32 %v1041_v13, %v631_v62 }
  0xba   : > { %v1285_v27 = vsel %vm770_vm0, %v1283_v23, %v1284_v38  ;;  %v1425_v46 = vmul.f32 %v3254_v8, %v3193_v29  ;;  %v1528_v48 = vrot.slane %v1423_v41, 4  ;;  %v1668_v21 = vmul.f32 %v3526_v40, %v3276_v39 }
  0xbb   : > { %v1287_v20 = vsel %vm770_vm0, %v1284_v38, %v1286_v36  ;;  %v1383_v15 = vadd.f32 %v1285_v27, %v891_v19  ;;  %v1529_v6 = vrot.slane %v1424_v54, 4  ;;  %v1669_v7 = vmul.f32 %v3529_v49, %v3276_v39 }
  0xbc   : > { %v1384_v62 = vadd.f32 %v1287_v20, %v892_v10  ;;  %v1531_v9 = vrot.slane %v1425_v46, 4  ;;  %v1670_v29 = vmul.f32 %v3276_v39, %v3546_v55  ;;  %v1772_v16 = vrot.slane %v1668_v21, 4 }
  0xbd   : > { %v1530_v14 = vsel %vm1507_vm1, %v1528_v48, %v1529_v6  ;;  %v1912_v28 = vmul.f32 %v3723_v11, %v3262_v32  ;;  %v1913_v60 = vmul.f32 %v3723_v11, %v3282_v45  ;;  %v1773_v61 = vrot.slane %v1669_v7, 4 }
  0xbe   : > { %v1532_v19 = vsel %vm1507_vm1, %v1529_v6, %v1531_v9  ;;  %v1628_v10 = vadd.f32 %v1530_v14, %v1137_v34  ;;  %v1775_v57 = vrot.slane %v1670_v29, 4  ;;  %v1914_v23 = vmul.f32 %v3723_v11, %v4429_v5 }
  0xbf   : > { %v1629_v4 = vadd.f32 %v1532_v19, %v1138_v58  ;;  %v2016_v38 = vrot.slane %v1912_v28, 4  ;;  %v2017_v41 = vrot.slane %v1913_v60, 4  ;;  %v1774_v13 = vsel %vm1507_vm1, %v1772_v16, %v1773_v61  ;;  %v398_v58 = vld [vmem:[%s3851_s30 + $0x8] sm:$0x3] }
  0xc0   : > { %v1776_v36 = vsel %vm1507_vm1, %v1773_v61, %v1775_v57  ;;  %v3871_v54 = vunpack.c.l.bf16 %v2818_v56  ;;  %v3873_v27 = vunpack.c.h.bf16 %v2818_v56  ;;  %v1872_v46 = vadd.f32 %v1774_v13, %v1383_v15 }
  0xc1   : > { %v1873_v48 = vadd.f32 %v1776_v36, %v1384_v62  ;;  %v2018_v34 = vsel %vm1507_vm1, %v2016_v38, %v2017_v41  ;;  %v2019_v20 = vrot.slane %v1914_v23, 4  ;;  %v470_v21 = vmul.f32 %v3301_v0, %v3180_v24 }
  0xc2   : > { %v2116_v6 = vadd.f32 %v2018_v34, %v1628_v10  ;;  %v471_v9 = vmul.f32 %v3303_v1, %v3180_v24  ;;  %v542_v7 = vmul.f32 %v3594_v37, %v3183_v25  ;;  %v543_v15 = vmul.f32 %v3596_v47, %v3183_v25 }
  0xc3   : > { %v2020_v29 = vsel %vm1507_vm1, %v2017_v41, %v2019_v20  ;;  %v614_v62 = vmul.f32 %v3871_v54, %v3186_v26  ;;  %v615_v14 = vmul.f32 %v3873_v27, %v3186_v26  ;;  %v710_v60 = vmul.f32 %v3301_v0, %v3196_v30 }
  0xc4   : > { %v2117_v16 = vadd.f32 %v2020_v29, %v1629_v4  ;;  %v2148_v28 = vadd.f32 %v2116_v6, %v1872_v46  ;;  %v711_v56 = vmul.f32 %v3303_v1, %v3196_v30  ;;  %v712_v61 = vmul.f32 %v3196_v30, %v3324_v35 }
  0xc5   : > { %v646_v19 = vadd.f32 %v614_v62, %v470_v21  ;;  %v647_v10 = vadd.f32 %v615_v14, %v471_v9  ;;  %v3896_v57 = vunpack.c.l.bf16 %v398_v58  ;;  %v831_v38 = vrot.slane %v710_v60, 2 }
  0xc6   : > { %v2149_v23 = vadd.f32 %v2117_v16, %v1873_v48  ;;  %v832_v41 = vrot.slane %v711_v56, 2  ;;  %v957_v4 = vmul.f32 %v3594_v37, %v3220_v42  ;;  %v834_v13 = vrot.slane %v712_v61, 2 }
  0xc7   : > { %v958_v36 = vmul.f32 %v3596_v47, %v3220_v42  ;;  %v959_v46 = vmul.f32 %v3220_v42, %v3614_v18  ;;  %v1203_v34 = vmul.f32 %v3871_v54, %v3223_v43  ;;  %v1204_v48 = vmul.f32 %v3873_v27, %v3223_v43 }
  0xc8   : > { %v2176_v20 = vpack.c.bf16 %v2149_v23, %v2148_v28  ;;  %v833_v6 = vsel %vm770_vm0, %v831_v38, %v832_v41  ;;  %v1077_v58 = vrot.slane %v957_v4, 2  ;;  %v835_v21 = vsel %vm770_vm0, %v832_v41, %v834_v13 }
  0xc9   : > { %v907_v9 = vadd.f32 %v833_v6, %v542_v7  ;;  %v1078_v29 = vrot.slane %v958_v36, 2  ;;  %v1080_v62 = vrot.slane %v959_v46, 2  ;;  %v908_v14 = vadd.f32 %v835_v21, %v543_v15 }
  0xca   : > { %2976 = vmatprep.mubr.bf16.mxu0 %v2176_v20  ;;  %v1205_v16 = vmul.f32 %v3223_v43, %v3896_v57  ;;  %v1323_v60 = vrot.slane %v1203_v34, 2  ;;  %v1324_v56 = vrot.slane %v1204_v48, 2  ;;  %v1447_v23 = vmul.f32 %v3301_v0, %v3254_v8 }
  0xcb   : > { %v1079_v28 = vsel %vm770_vm0, %v1077_v58, %v1078_v29  ;;  %v1081_v61 = vsel %vm770_vm0, %v1078_v29, %v1080_v62  ;;  %v1448_v38 = vmul.f32 %v3303_v1, %v3254_v8  ;;  %v1449_v36 = vmul.f32 %v3254_v8, %v3324_v35 }
  0xcc   : > { %v1153_v7 = vadd.f32 %v1079_v28, %v646_v19  ;;  %v1154_v41 = vadd.f32 %v1081_v61, %v647_v10  ;;  %v1325_v4 = vsel %vm770_vm0, %v1323_v60, %v1324_v56  ;;  %v1326_v15 = vrot.slane %v1205_v16, 2 }
  0xcd   : > { %v1399_v13 = vadd.f32 %v1325_v4, %v907_v9  ;;  %v1568_v46 = vrot.slane %v1447_v23, 4  ;;  %v1569_v34 = vrot.slane %v1448_v38, 4  ;;  %v1692_v6 = vmul.f32 %v3594_v37, %v3276_v39 }
  0xce   : > { %v1327_v20 = vsel %vm770_vm0, %v1324_v56, %v1326_v15  ;;  %v1693_v0 = vmul.f32 %v3596_v47, %v3276_v39  ;;  %v1694_v1 = vmul.f32 %v3276_v39, %v3614_v18  ;;  %v1571_v58 = vrot.slane %v1449_v36, 4 }
  0xcf   : > { %v1400_v19 = vadd.f32 %v1327_v20, %v908_v14  ;;  %v1570_v10 = vsel %vm1507_vm1, %v1568_v46, %v1569_v34  ;;  %v1936_v35 = vmul.f32 %v3723_v11, %v3871_v54  ;;  %v1812_v21 = vrot.slane %v1692_v6, 4 }
  0xd0   : > { %v1644_v48 = vadd.f32 %v1570_v10, %v1153_v7  ;;  %v1813_v9 = vrot.slane %v1693_v0, 4  ;;  %v1815_v29 = vrot.slane %v1694_v1, 4  ;;  %v1572_v62 = vsel %vm1507_vm1, %v1569_v34, %v1571_v58  ;;  %v4430_v34 = vld [vmem:[#allocation6_spill] sm:$0xff] }
  0xd1   : > { %v1937_v16 = vmul.f32 %v3723_v11, %v3873_v27  ;;  %v1938_v60 = vmul.f32 %v3723_v11, %v3896_v57  ;;  %v2056_v56 = vrot.slane %v1936_v35, 4  ;;  %v1645_v14 = vadd.f32 %v1572_v62, %v1154_v41 }
  0xd2   : > { %v1814_v28 = vsel %vm1507_vm1, %v1812_v21, %v1813_v9  ;;  %v1816_v61 = vsel %vm1507_vm1, %v1813_v9, %v1815_v29  ;;  %v456_v23 = vmul.f32 %v3180_v24, %v3384_v12  ;;  %v457_v36 = vmul.f32 %v3180_v24, %v3386_v17 }
  0xd3   : > { %v1888_v38 = vadd.f32 %v1814_v28, %v1399_v13  ;;  %v1889_v7 = vadd.f32 %v1816_v61, %v1400_v19  ;;  %v2057_v4 = vrot.slane %v1937_v16, 4  ;;  %v2059_v15 = vrot.slane %v1938_v60, 4  ;;  %v4431_v13 = vld [vmem:[#allocation7_spill] sm:$0xff] }
  0xd4   : > { %v528_v46 = vmul.f32 %v3183_v25, %v3662_v31  ;;  %v529_v41 = vmul.f32 %v3183_v25, %v3666_v50  ;;  %v600_v20 = vmul.f32 %v3186_v26, %v4430_v34  ;;  %v601_v1 = vmul.f32 %v3186_v26, %v4431_v13 }
  0xd5   : > { %v2058_v6 = vsel %vm1507_vm1, %v2056_v56, %v2057_v4  ;;  %v2060_v0 = vsel %vm1507_vm1, %v2057_v4, %v2059_v15  ;;  %v689_v19 = vmul.f32 %v3196_v30, %v3384_v12  ;;  %v690_v21 = vmul.f32 %v3196_v30, %v3386_v17 }
  0xd6   : > { %v2132_v10 = vadd.f32 %v2058_v6, %v1644_v48  ;;  %v2133_v58 = vadd.f32 %v2060_v0, %v1645_v14  ;;  %v632_v35 = vadd.f32 %v600_v20, %v456_v23  ;;  %v633_v9 = vadd.f32 %v601_v1, %v457_v36  ;;  %v4432_v14 = vld [vmem:[#allocation10_spill] sm:$0xff] }
  0xd7   : > { %v691_v29 = vmul.f32 %v3196_v30, %v3400_v44  ;;  %v796_v62 = vrot.slane %v689_v19, 2  ;;  %v936_v16 = vmul.f32 %v3220_v42, %v3662_v31  ;;  %v797_v28 = vrot.slane %v690_v21, 2  ;;  %v4433_v19 = vld [vmem:[#allocation8_spill] sm:$0xff] }
  0xd8   : > { %v2164_v60 = vadd.f32 %v2132_v10, %v1888_v38  ;;  %v2165_v56 = vadd.f32 %v2133_v58, %v1889_v7  ;;  %v937_v61 = vmul.f32 %v3220_v42, %v3666_v50  ;;  %v938_v23 = vmul.f32 %v3220_v42, %v4432_v14 }
  0xd9   : > { %v799_v48 = vrot.slane %v691_v29, 2  ;;  %v1042_v4 = vrot.slane %v936_v16, 2  ;;  %v1182_v15 = vmul.f32 %v3223_v43, %v4430_v34  ;;  %v798_v20 = vsel %vm770_vm0, %v796_v62, %v797_v28 }
  0xda   : > { %v2184_v36 = vpack.c.bf16 %v2165_v56, %v2164_v60  ;;  %v1043_v6 = vrot.slane %v937_v61, 2  ;;  %v1183_v38 = vmul.f32 %v3223_v43, %v4431_v13  ;;  %v893_v0 = vadd.f32 %v798_v20, %v528_v46 }
  0xdb   : > { %v800_v7 = vsel %vm770_vm0, %v797_v28, %v799_v48  ;;  %v1045_v1 = vrot.slane %v938_v23, 2  ;;  %v1184_v10 = vmul.f32 %v3223_v43, %v4433_v19  ;;  %v1288_v29 = vrot.slane %v1182_v15, 2 }
  0xdc   : > { %2992 = vmatprep.mubr.bf16.mxu1 %v2184_v36  ;;  %v894_v58 = vadd.f32 %v800_v7, %v529_v41  ;;  %v1044_v21 = vsel %vm770_vm0, %v1042_v4, %v1043_v6  ;;  %v1289_v16 = vrot.slane %v1183_v38, 2  ;;  %v1426_v61 = vmul.f32 %v3254_v8, %v3384_v12 }
  0xdd   : > { %v1046_v60 = vsel %vm770_vm0, %v1043_v6, %v1045_v1  ;;  %v1139_v62 = vadd.f32 %v1044_v21, %v632_v35  ;;  %v1291_v56 = vrot.slane %v1184_v10, 2  ;;  %v1427_v28 = vmul.f32 %v3254_v8, %v3386_v17  ;;  %v399_v10 = vld [vmem:[%s3851_s30 + $0xc] sm:$0xff]  }
  0xde   : > { %v1140_v63 = vadd.f32 %v1046_v60, %v633_v9  ;;  %v1290_v46 = vsel %vm770_vm0, %v1288_v29, %v1289_v16  ;;  %v1428_v41 = vmul.f32 %v3254_v8, %v3400_v44  ;;  %v1533_v4 = vrot.slane %v1426_v61, 4 }
  0xdf   : > { %v1292_v48 = vsel %vm770_vm0, %v1289_v16, %v1291_v56  ;;  %v1385_v23 = vadd.f32 %v1290_v46, %v893_v0  ;;  %v1671_v35 = vmul.f32 %v3276_v39, %v3662_v31  ;;  %v1534_v36 = vrot.slane %v1427_v28, 4 }
  0xe0   : > { %v1386_v15 = vadd.f32 %v1292_v48, %v894_v58  ;;  %v1536_v12 = vrot.slane %v1428_v41, 4  ;;  %v1672_v9 = vmul.f32 %v3276_v39, %v3666_v50  ;;  %v1673_v17 = vmul.f32 %v3276_v39, %v4432_v14 }
  0xe1   : > { %v1777_v20 = vrot.slane %v1671_v35, 4  ;;  %v1915_v44 = vmul.f32 %v3723_v11, %v4430_v34  ;;  %v1916_v6 = vmul.f32 %v3723_v11, %v4431_v13  ;;  %v1535_v38 = vsel %vm1507_vm1, %v1533_v4, %v1534_v36 }
  0xe2   : > { %v1537_v7 = vsel %vm1507_vm1, %v1534_v36, %v1536_v12  ;;  %v1778_v0 = vrot.slane %v1672_v9, 4  ;;  %v1917_v1 = vmul.f32 %v3723_v11, %v4433_v19  ;;  %v1630_v58 = vadd.f32 %v1535_v38, %v1139_v62  ;;  %v401_v36 = vld [vmem:[%s3851_s30 + $0x14] sm:$0x3] }
  0xe3   : > { %v1631_v21 = vadd.f32 %v1537_v7, %v1140_v63  ;;  %v1780_v29 = vrot.slane %v1673_v17, 4  ;;  %v2021_v16 = vrot.slane %v1915_v44, 4  ;;  %v2022_v56 = vrot.slane %v1916_v6, 4 }
  0xe4   : > { %v1779_v60 = vsel %vm1507_vm1, %v1777_v20, %v1778_v0  ;;  %v2024_v61 = vrot.slane %v1917_v1, 4  ;;  %v472_v46 = vmul.f32 %v3180_v24, %v3458_v52  ;;  %v473_v48 = vmul.f32 %v3180_v24, %v3460_v53 }
  0xe5   : > { %v1781_v28 = vsel %vm1507_vm1, %v1778_v0, %v1780_v29  ;;  %v1874_v41 = vadd.f32 %v1779_v60, %v1385_v23  ;;  %v4003_v4 = vunpack.c.l.bf16 %v399_v10  ;;  %v2023_v63 = vsel %vm1507_vm1, %v2021_v16, %v2022_v56 }
  0xe6   : > { %v1875_v35 = vadd.f32 %v1781_v28, %v1386_v15  ;;  %v2025_v62 = vsel %vm1507_vm1, %v2022_v56, %v2024_v61  ;;  %v4008_v12 = vunpack.c.h.bf16 %v399_v10  ;;  %v2118_v9 = vadd.f32 %v2023_v63, %v1630_v58 }
  0xe7   : > { %v2119_v17 = vadd.f32 %v2025_v62, %v1631_v21  ;;  %v544_v20 = vmul.f32 %v3183_v25, %v3735_v59  ;;  %v545_v23 = vmul.f32 %v3183_v25, %v3737_v3  ;;  %v616_v44 = vmul.f32 %v3186_v26, %v4003_v4 }
  0xe8   : > { %v617_v15 = vmul.f32 %v3186_v26, %v4008_v12  ;;  %v713_v6 = vmul.f32 %v3196_v30, %v3458_v52  ;;  %v714_v38 = vmul.f32 %v3196_v30, %v3460_v53  ;;  %v2150_v7 = vadd.f32 %v2118_v9, %v1874_v41 }
  0xe9   : > { %v2151_v0 = vadd.f32 %v2119_v17, %v1875_v35  ;;  %v715_v1 = vmul.f32 %v3196_v30, %v3478_v2  ;;  %v4024_v10 = vunpack.c.l.bf16 %v401_v36  ;;  %v648_v58 = vadd.f32 %v616_v44, %v472_v46 }
  0xea   : > { %v649_v21 = vadd.f32 %v617_v15, %v473_v48  ;;  %v836_v29 = vrot.slane %v713_v6, 2  ;;  %v837_v16 = vrot.slane %v714_v38, 2  ;;  %v960_v61 = vmul.f32 %v3220_v42, %v3735_v59 }
  0xeb   : > { %v2177_v60 = vpack.c.bf16 %v2151_v0, %v2150_v7  ;;  %v839_v56 = vrot.slane %v715_v1, 2  ;;  %v961_v28 = vmul.f32 %v3220_v42, %v3737_v3  ;;  %v962_v35 = vmul.f32 %v3220_v42, %v3755_v33 }
  0xec   : > { %v838_v41 = vsel %vm770_vm0, %v836_v29, %v837_v16  ;;  %v1206_v63 = vmul.f32 %v3223_v43, %v4003_v4  ;;  %v1207_v46 = vmul.f32 %v3223_v43, %v4008_v12  ;;  %v1082_v36 = vrot.slane %v960_v61, 2 }
  0xed   : > { %2977 = vmatmul.mubr.bf16.gmra.mrb[8].mxu0 %v2177_v60  ;;  %v840_v48 = vsel %vm770_vm0, %v837_v16, %v839_v56  ;;  %v909_v62 = vadd.f32 %v838_v41, %v544_v20  ;;  %v1083_v9 = vrot.slane %v961_v28, 2  ;;  %v1085_v44 = vrot.slane %v962_v35, 2 }
  0xee   : > { %v910_v17 = vadd.f32 %v840_v48, %v545_v23  ;;  %v1208_v15 = vmul.f32 %v3223_v43, %v4024_v10  ;;  %v1328_v6 = vrot.slane %v1206_v63, 2  ;;  %v1329_v7 = vrot.slane %v1207_v46, 2 }
  0xef   : > { %v1084_v38 = vsel %vm770_vm0, %v1082_v36, %v1083_v9  ;;  %v1450_v0 = vmul.f32 %v3254_v8, %v3458_v52  ;;  %v1451_v1 = vmul.f32 %v3254_v8, %v3460_v53  ;;  %v1086_v29 = vsel %vm770_vm0, %v1083_v9, %v1085_v44 }
  0xf0   : > { %v1155_v20 = vadd.f32 %v1084_v38, %v648_v58  ;;  %v1331_v16 = vrot.slane %v1208_v15, 2  ;;  %v1452_v23 = vmul.f32 %v3254_v8, %v3478_v2  ;;  %v1156_v60 = vadd.f32 %v1086_v29, %v649_v21 }
  0xf1   : > { %v1330_v56 = vsel %vm770_vm0, %v1328_v6, %v1329_v7  ;;  %v1573_v61 = vrot.slane %v1450_v0, 4  ;;  %v1574_v28 = vrot.slane %v1451_v1, 4  ;;  %v1695_v52 = vmul.f32 %v3276_v39, %v3735_v59 }
  0xf2   : > { %v1332_v41 = vsel %vm770_vm0, %v1329_v7, %v1331_v16  ;;  %v1401_v35 = vadd.f32 %v1330_v56, %v909_v62  ;;  %v1576_v63 = vrot.slane %v1452_v23, 4  ;;  %v1696_v58 = vmul.f32 %v3276_v39, %v3737_v3 }
  0xf3   : > { %v1402_v53 = vadd.f32 %v1332_v41, %v910_v17  ;;  %v1575_v46 = vsel %vm1507_vm1, %v1573_v61, %v1574_v28  ;;  %v1697_v2 = vmul.f32 %v3276_v39, %v3755_v33  ;;  %v1817_v36 = vrot.slane %v1695_v52, 4  ;;  %v4434_v41 = vld [vmem:[#allocation2_spill] sm:$0xff]  ;;  %v4435_v52 = vld [vmem:[#allocation3_spill] sm:$0xff] }
  0xf4   : > { %v1577_v21 = vsel %vm1507_vm1, %v1574_v28, %v1576_v63  ;;  %v1646_v48 = vadd.f32 %v1575_v46, %v1155_v20  ;;  %v1939_v62 = vmul.f32 %v3723_v11, %v4003_v4  ;;  %v1818_v44 = vrot.slane %v1696_v58, 4 }
  0xf5   : > { %v1647_v9 = vadd.f32 %v1577_v21, %v1156_v60  ;;  %v1820_v15 = vrot.slane %v1697_v2, 4  ;;  %v1940_v17 = vmul.f32 %v3723_v11, %v4008_v12  ;;  %v1941_v6 = vmul.f32 %v3723_v11, %v4024_v10 }
  0xf6   : > { %v2061_v38 = vrot.slane %v1939_v62, 4  ;;  %v458_v7 = vmul.f32 %v3526_v40, %v3180_v24  ;;  %v459_v0 = vmul.f32 %v3529_v49, %v3180_v24  ;;  %v1819_v1 = vsel %vm1507_vm1, %v1817_v36, %v1818_v44 }
  0xf7   : > { %v1821_v29 = vsel %vm1507_vm1, %v1818_v44, %v1820_v15  ;;  %v2062_v20 = vrot.slane %v1940_v17, 4  ;;  %v530_v16 = vmul.f32 %v3262_v32, %v3183_v25  ;;  %v1890_v23 = vadd.f32 %v1819_v1, %v1401_v35 }
  0xf8   : > { %v1891_v60 = vadd.f32 %v1821_v29, %v1402_v53  ;;  %v2064_v56 = vrot.slane %v1941_v6, 4  ;;  %v531_v61 = vmul.f32 %v3282_v45, %v3183_v25  ;;  %v602_v63 = vmul.f32 %v4434_v41, %v3186_v26 }
  0xf9   : > { %v2063_v28 = vsel %vm1507_vm1, %v2061_v38, %v2062_v20  ;;  %v603_v46 = vmul.f32 %v4435_v52, %v3186_v26  ;;  %v692_v58 = vmul.f32 %v3526_v40, %v3196_v30  ;;  %v693_v35 = vmul.f32 %v3529_v49, %v3196_v30 }
  0xfa   : > { %v2065_v2 = vsel %vm1507_vm1, %v2062_v20, %v2064_v56  ;;  %v2134_v21 = vadd.f32 %v2063_v28, %v1646_v48  ;;  %v694_v53 = vmul.f32 %v3196_v30, %v3546_v55  ;;  %v634_v62 = vadd.f32 %v602_v63, %v458_v7 }
  0xfb   : > { %v2135_v36 = vadd.f32 %v2065_v2, %v1647_v9  ;;  %v635_v44 = vadd.f32 %v603_v46, %v459_v0  ;;  %v801_v15 = vrot.slane %v692_v58, 2  ;;  %v802_v6 = vrot.slane %v693_v35, 2  ;;  %v4436_v2 = vld [vmem:[#allocation5_spill] sm:$0xff] }
  0xfc   : > { %v2166_v17 = vadd.f32 %v2134_v21, %v1890_v23  ;;  %v804_v38 = vrot.slane %v694_v53, 2  ;;  %v939_v1 = vmul.f32 %v3262_v32, %v3220_v42  ;;  %v940_v48 = vmul.f32 %v3282_v45, %v3220_v42 }
  0xfd   : > { %v2167_v29 = vadd.f32 %v2135_v36, %v1891_v60  ;;  %v941_v20 = vmul.f32 %v3220_v42, %v4429_v5  ;;  %v1185_v56 = vmul.f32 %v4434_v41, %v3223_v43  ;;  %v803_v9 = vsel %vm770_vm0, %v801_v15, %v802_v6 }
  0xfe   : > { %v805_v7 = vsel %vm770_vm0, %v802_v6, %v804_v38  ;;  %v1047_v0 = vrot.slane %v939_v1, 2  ;;  %v1186_v23 = vmul.f32 %v4435_v52, %v3223_v43  ;;  %v895_v63 = vadd.f32 %v803_v9, %v530_v16 }
  0xff   : > { %v2185_v28 = vpack.c.bf16 %v2167_v29, %v2166_v17  ;;  %v896_v60 = vadd.f32 %v805_v7, %v531_v61  ;;  %v1048_v46 = vrot.slane %v940_v48, 2  ;;  %v1050_v58 = vrot.slane %v941_v20, 2 }
 0x100   : > { %v1187_v21 = vmul.f32 %v3223_v43, %v4436_v2  ;;  %v1293_v35 = vrot.slane %v1185_v56, 2  ;;  %v1294_v53 = vrot.slane %v1186_v23, 2  ;;  %v1429_v15 = vmul.f32 %v3526_v40, %v3254_v8  ;;  %v2912_v23 = vld [vmem:[%s3851_s30 + $0x18] sm:$0xff]  }
 0x101   : > { %2993 = vmatmul.mubr.bf16.gmra.mrb[8].mxu1 %v2185_v28  ;;  %v1049_v36 = vsel %vm770_vm0, %v1047_v0, %v1048_v46  ;;  %v1430_v6 = vmul.f32 %v3529_v49, %v3254_v8  ;;  %v1431_v16 = vmul.f32 %v3254_v8, %v3546_v55  ;;  %v1051_v61 = vsel %vm770_vm0, %v1048_v46, %v1050_v58 }
 0x102   : > { %v1141_v17 = vadd.f32 %v1049_v36, %v634_v62  ;;  %v1295_v38 = vsel %vm770_vm0, %v1293_v35, %v1294_v53  ;;  %v1296_v1 = vrot.slane %v1187_v21, 2  ;;  %v1142_v29 = vadd.f32 %v1051_v61, %v635_v44 }
 0x103   : > { %v1387_v48 = vadd.f32 %v1295_v38, %v895_v63  ;;  %v1538_v20 = vrot.slane %v1429_v15, 4  ;;  %v1539_v56 = vrot.slane %v1430_v6, 4  ;;  %v1541_v40 = vrot.slane %v1431_v16, 4 }
 0x104   : > { %v1297_v9 = vsel %vm770_vm0, %v1294_v53, %v1296_v1  ;;  %v1674_v49 = vmul.f32 %v3262_v32, %v3276_v39  ;;  %v1675_v55 = vmul.f32 %v3282_v45, %v3276_v39  ;;  %v1676_v62 = vmul.f32 %v3276_v39, %v4429_v5 }
 0x105   : > { %v1388_v7 = vadd.f32 %v1297_v9, %v896_v60  ;;  %v1540_v0 = vsel %vm1507_vm1, %v1538_v20, %v1539_v56  ;;  %v1918_v44 = vmul.f32 %v3723_v11, %v4434_v41  ;;  %v1542_v28 = vsel %vm1507_vm1, %v1539_v56, %v1541_v40  ;;  %v404_v40 = vld [vmem:[%s3851_s30 + $0x20] sm:$0x3] }
 0x106   : > { %v1632_v63 = vadd.f32 %v1540_v0, %v1141_v17  ;;  %v1782_v46 = vrot.slane %v1674_v49, 4  ;;  %v1783_v58 = vrot.slane %v1675_v55, 4  ;;  %v1633_v21 = vadd.f32 %v1542_v28, %v1142_v29 }
 0x107   : > { %v1785_v32 = vrot.slane %v1676_v62, 4  ;;  %v1919_v45 = vmul.f32 %v3723_v11, %v4435_v52  ;;  %v1920_v60 = vmul.f32 %v3723_v11, %v4436_v2  ;;  %v2026_v5 = vrot.slane %v1918_v44, 4 }
 0x108   : > { %v1784_v35 = vsel %vm1507_vm1, %v1782_v46, %v1783_v58  ;;  %v4126_v53 = vunpack.c.l.bf16 %v2912_v23  ;;  %v4128_v41 = vunpack.c.h.bf16 %v2912_v23  ;;  %v474_v52 = vmul.f32 %v3594_v37, %v3180_v24 }
 0x109   : > { %v1786_v36 = vsel %vm1507_vm1, %v1783_v58, %v1785_v32  ;;  %v1876_v15 = vadd.f32 %v1784_v35, %v1387_v48  ;;  %v2027_v6 = vrot.slane %v1919_v45, 4  ;;  %v2029_v16 = vrot.slane %v1920_v60, 4 }
 0x10a   : > { %v1877_v61 = vadd.f32 %v1786_v36, %v1388_v7  ;;  %v475_v11 = vmul.f32 %v3596_v47, %v3180_v24  ;;  %v546_v2 = vmul.f32 %v3871_v54, %v3183_v25  ;;  %v547_v1 = vmul.f32 %v3873_v27, %v3183_v25 }
 0x10b   : > { %v2028_v17 = vsel %vm1507_vm1, %v2026_v5, %v2027_v6  ;;  %v2030_v38 = vsel %vm1507_vm1, %v2027_v6, %v2029_v16  ;;  %v618_v29 = vmul.f32 %v4126_v53, %v3186_v26  ;;  %v619_v56 = vmul.f32 %v4128_v41, %v3186_v26 }
 0x10c   : > { %v2120_v48 = vadd.f32 %v2028_v17, %v1632_v63  ;;  %v2121_v20 = vadd.f32 %v2030_v38, %v1633_v21  ;;  %v716_v9 = vmul.f32 %v3594_v37, %v3196_v30  ;;  %v717_v55 = vmul.f32 %v3596_v47, %v3196_v30 }
 0x10d   : > { %v650_v49 = vadd.f32 %v618_v29, %v474_v52  ;;  %v718_v7 = vmul.f32 %v3196_v30, %v3614_v18  ;;  %v963_v0 = vmul.f32 %v3871_v54, %v3220_v42  ;;  %v651_v23 = vadd.f32 %v619_v56, %v475_v11 }
 0x10e   : > { %v2152_v62 = vadd.f32 %v2120_v48, %v1876_v15  ;;  %v2153_v44 = vadd.f32 %v2121_v20, %v1877_v61  ;;  %v841_v28 = vrot.slane %v716_v9, 2  ;;  %v842_v63 = vrot.slane %v717_v55, 2 }
 0x10f   : > { %v844_v46 = vrot.slane %v718_v7, 2  ;;  %v964_v58 = vmul.f32 %v3873_v27, %v3220_v42  ;;  %v965_v21 = vmul.f32 %v3220_v42, %v3896_v57  ;;  %v1087_v45 = vrot.slane %v963_v0, 2 }
 0x110   : > { %v2178_v32 = vpack.c.bf16 %v2153_v44, %v2152_v62  ;;  %v1161_v60 = vunpack.c.l.bf16 %v404_v40  ;;  %v1209_v35 = vmul.f32 %v4126_v53, %v3223_v43  ;;  %v843_v5 = vsel %vm770_vm0, %v841_v28, %v842_v63 }
 0x111   : > { %v845_v36 = vsel %vm770_vm0, %v842_v63, %v844_v46  ;;  %v1088_v15 = vrot.slane %v964_v58, 2  ;;  %v1090_v6 = vrot.slane %v965_v21, 2  ;;  %v911_v16 = vadd.f32 %v843_v5, %v546_v2 }
 0x112   : > { %2980 = vmatprep.mubr.bf16.mxu0 %v2178_v32  ;;  %v912_v61 = vadd.f32 %v845_v36, %v547_v1  ;;  %v1210_v52 = vmul.f32 %v4128_v41, %v3223_v43  ;;  %v1211_v11 = vmul.f32 %v3223_v43, %v1161_v60  ;;  %v1333_v29 = vrot.slane %v1209_v35, 2 }
 0x113   : > { %v1089_v17 = vsel %vm770_vm0, %v1087_v45, %v1088_v15  ;;  %v1091_v38 = vsel %vm770_vm0, %v1088_v15, %v1090_v6  ;;  %v1453_v48 = vmul.f32 %v3594_v37, %v3254_v8  ;;  %v1454_v2 = vmul.f32 %v3596_v47, %v3254_v8 }
 0x114   : > { %v1157_v20 = vadd.f32 %v1089_v17, %v650_v49  ;;  %v1158_v56 = vadd.f32 %v1091_v38, %v651_v23  ;;  %v1334_v9 = vrot.slane %v1210_v52, 2  ;;  %v1336_v40 = vrot.slane %v1211_v11, 2 }
 0x115   : > { %v1455_v1 = vmul.f32 %v3254_v8, %v3614_v18  ;;  %v1578_v55 = vrot.slane %v1453_v48, 4  ;;  %v1698_v7 = vmul.f32 %v3871_v54, %v3276_v39  ;;  %v1699_v37 = vmul.f32 %v3873_v27, %v3276_v39  ;;  %v4184_v54 = vld [vmem:[%s4398_s2 + $0x8] ss:$0 sm:$0xff] }
 0x116   : > { %v1335_v0 = vsel %vm770_vm0, %v1333_v29, %v1334_v9  ;;  %v1337_v62 = vsel %vm770_vm0, %v1334_v9, %v1336_v40  ;;  %v1700_v49 = vmul.f32 %v3276_v39, %v3896_v57  ;;  %v1579_v47 = vrot.slane %v1454_v2, 4 }
 0x117   : > { %v1403_v44 = vadd.f32 %v1335_v0, %v911_v16  ;;  %v1404_v23 = vadd.f32 %v1337_v62, %v912_v61  ;;  %v1581_v28 = vrot.slane %v1455_v1, 4  ;;  %v1822_v63 = vrot.slane %v1698_v7, 4 }
 0x118   : > { %v1823_v18 = vrot.slane %v1699_v37, 4  ;;  %v1825_v46 = vrot.slane %v1700_v49, 4  ;;  %v1942_v58 = vmul.f32 %v4184_v54, %v4126_v53  ;;  %v1580_v27 = vsel %vm1507_vm1, %v1578_v55, %v1579_v47 }
 0x119   : > { %v1582_v21 = vsel %vm1507_vm1, %v1579_v47, %v1581_v28  ;;  %v1943_v57 = vmul.f32 %v4184_v54, %v4128_v41  ;;  %v1944_v32 = vmul.f32 %v4184_v54, %v1161_v60  ;;  %v1648_v45 = vadd.f32 %v1580_v27, %v1157_v20 }
 0x11a   : > { %v1649_v35 = vadd.f32 %v1582_v21, %v1158_v56  ;;  %v1824_v5 = vsel %vm1507_vm1, %v1822_v63, %v1823_v18  ;;  %v1826_v36 = vsel %vm1507_vm1, %v1823_v18, %v1825_v46  ;;  %v2066_v16 = vrot.slane %v1942_v58, 4 }
 0x11b   : > { %v1892_v15 = vadd.f32 %v1824_v5, %v1403_v44  ;;  %v1893_v6 = vadd.f32 %v1826_v36, %v1404_v23  ;;  %v2067_v61 = vrot.slane %v1943_v57, 4  ;;  %v2069_v53 = vrot.slane %v1944_v32, 4 }
 0x11c   : > { %v460_v52 = vmul.f32 %v3180_v24, %v3662_v31  ;;  %v461_v11 = vmul.f32 %v3180_v24, %v3666_v50  ;;  %v532_v41 = vmul.f32 %v3183_v25, %v4430_v34  ;;  %v533_v17 = vmul.f32 %v3183_v25, %v4431_v13 }
 0x11d   : > { %v2068_v60 = vsel %vm1507_vm1, %v2066_v16, %v2067_v61  ;;  %v604_v38 = vmul.f32 %v3186_v26, %v3451_v51  ;;  %v605_v29 = vmul.f32 %v3186_v26, %v3453_v22  ;;  %v2070_v48 = vsel %vm1507_vm1, %v2067_v61, %v2069_v53 }
 0x11e   : > { %v2136_v20 = vadd.f32 %v2068_v60, %v1648_v45  ;;  %v695_v56 = vmul.f32 %v3196_v30, %v3662_v31  ;;  %v696_v9 = vmul.f32 %v3196_v30, %v3666_v50  ;;  %v2137_v40 = vadd.f32 %v2070_v48, %v1649_v35  ;;  %v4437_v35 = vld [vmem:[#allocation9_spill] sm:$0xff] }
 0x11f   : > { %v636_v2 = vadd.f32 %v604_v38, %v460_v52  ;;  %v637_v1 = vadd.f32 %v605_v29, %v461_v11  ;;  %v697_v55 = vmul.f32 %v3196_v30, %v4432_v14  ;;  %v942_v37 = vmul.f32 %v3220_v42, %v4430_v34 }
 0x120   : > { %v2168_v7 = vadd.f32 %v2136_v20, %v1892_v15  ;;  %v806_v0 = vrot.slane %v695_v56, 2  ;;  %v807_v62 = vrot.slane %v696_v9, 2  ;;  %v2169_v49 = vadd.f32 %v2137_v40, %v1893_v6 }
 0x121   : > { %v809_v44 = vrot.slane %v697_v55, 2  ;;  %v943_v23 = vmul.f32 %v3220_v42, %v4431_v13  ;;  %v944_v47 = vmul.f32 %v3220_v42, %v4433_v19  ;;  %v1052_v63 = vrot.slane %v942_v37, 2 }
 0x122   : > { %v808_v28 = vsel %vm770_vm0, %v806_v0, %v807_v62  ;;  %v1188_v18 = vmul.f32 %v3223_v43, %v3451_v51  ;;  %v1189_v46 = vmul.f32 %v3223_v43, %v3453_v22  ;;  %v2186_v58 = vpack.c.bf16 %v2169_v49, %v2168_v7 }
 0x123   : > { %v810_v27 = vsel %vm770_vm0, %v807_v62, %v809_v44  ;;  %v897_v21 = vadd.f32 %v808_v28, %v532_v41  ;;  %v1053_v57 = vrot.slane %v943_v23, 2  ;;  %v1055_v45 = vrot.slane %v944_v47, 2  ;;  %v405_v44 = vld [vmem:[%s3851_s30 + $0x24] sm:$0xff]  }
 0x124   : > { %v898_v32 = vadd.f32 %v810_v27, %v533_v17  ;;  %v1190_v5 = vmul.f32 %v3223_v43, %v4437_v35  ;;  %v1298_v36 = vrot.slane %v1188_v18, 2  ;;  %2996 = vmatprep.mubr.bf16.mxu1 %v2186_v58  ;;  %v1299_v6 = vrot.slane %v1189_v46, 2 }
 0x125   : > { %v1054_v15 = vsel %vm770_vm0, %v1052_v63, %v1053_v57  ;;  %v1432_v16 = vmul.f32 %v3254_v8, %v3662_v31  ;;  %v1433_v61 = vmul.f32 %v3254_v8, %v3666_v50  ;;  %v1056_v53 = vsel %vm770_vm0, %v1053_v57, %v1055_v45 }
 0x126   : > { %v1143_v52 = vadd.f32 %v1054_v15, %v636_v2  ;;  %v1301_v11 = vrot.slane %v1190_v5, 2  ;;  %v1434_v41 = vmul.f32 %v3254_v8, %v4432_v14  ;;  %v1144_v60 = vadd.f32 %v1056_v53, %v637_v1 }
 0x127   : > { %v1300_v17 = vsel %vm770_vm0, %v1298_v36, %v1299_v6  ;;  %v1543_v38 = vrot.slane %v1432_v16, 4  ;;  %v1544_v29 = vrot.slane %v1433_v61, 4  ;;  %v1677_v50 = vmul.f32 %v3276_v39, %v4430_v34 }
 0x128   : > { %v1302_v48 = vsel %vm770_vm0, %v1299_v6, %v1301_v11  ;;  %v1389_v20 = vadd.f32 %v1300_v17, %v897_v21  ;;  %v1546_v56 = vrot.slane %v1434_v41, 4  ;;  %v1678_v40 = vmul.f32 %v3276_v39, %v4431_v13 }
 0x129   : > { %v1390_v31 = vadd.f32 %v1302_v48, %v898_v32  ;;  %v1545_v9 = vsel %vm1507_vm1, %v1543_v38, %v1544_v29  ;;  %v1679_v14 = vmul.f32 %v3276_v39, %v4433_v19  ;;  %v1787_v55 = vrot.slane %v1677_v50, 4 }
 0x12a   : > { %v1547_v2 = vsel %vm1507_vm1, %v1544_v29, %v1546_v56  ;;  %v1634_v1 = vadd.f32 %v1545_v9, %v1143_v52  ;;  %v1921_v7 = vmul.f32 %v4184_v54, %v3451_v51  ;;  %v1788_v62 = vrot.slane %v1678_v40, 4  ;;  %v407_v29 = vld [vmem:[%s3851_s30 + $0x2c] sm:$0x3] }
 0x12b   : > { %v1635_v0 = vadd.f32 %v1547_v2, %v1144_v60  ;;  %v1790_v37 = vrot.slane %v1679_v14, 4  ;;  %v1922_v34 = vmul.f32 %v4184_v54, %v3453_v22  ;;  %v1923_v49 = vmul.f32 %v4184_v54, %v4437_v35 }
 0x12c   : > { %v2031_v13 = vrot.slane %v1921_v7, 4  ;;  %v476_v19 = vmul.f32 %v3180_v24, %v3735_v59  ;;  %v477_v23 = vmul.f32 %v3180_v24, %v3737_v3  ;;  %v1789_v47 = vsel %vm1507_vm1, %v1787_v55, %v1788_v62  ;;  %v4262_v22 = vpop.f32.mrb[0].mxu0 }
 0x12d   : > { %v1791_v51 = vsel %vm1507_vm1, %v1788_v62, %v1790_v37  ;;  %v2032_v28 = vrot.slane %v1922_v34, 4  ;;  %v548_v63 = vmul.f32 %v3183_v25, %v4003_v4  ;;  %v1878_v18 = vadd.f32 %v1789_v47, %v1389_v20  ;;  %v4266_v21 = vpop.f32.mrb[1].mxu0 }
 0x12e   : > { %v1879_v46 = vadd.f32 %v1791_v51, %v1390_v31  ;;  %v2034_v58 = vrot.slane %v1923_v49, 4  ;;  %v549_v27 = vmul.f32 %v3183_v25, %v4008_v12  ;;  %v584_v57 = vunpack.c.l.bf16 %v405_v44  ;;  %v4273_v35 = vpop.f32.mrb[2].mxu0 }
 0x12f   : > { %v2033_v24 = vsel %vm1507_vm1, %v2031_v13, %v2032_v28  ;;  %v4269_v32 = vunpack.c.h.bf16 %v405_v44  ;;  %v719_v45 = vmul.f32 %v3196_v30, %v3735_v59  ;;  %v720_v15 = vmul.f32 %v3196_v30, %v3737_v3  ;;  %v4280_v6 = vpop.f32.mrb[3].mxu0 }
 0x130   : > { %v2035_v5 = vsel %vm1507_vm1, %v2032_v28, %v2034_v58  ;;  %v2122_v36 = vadd.f32 %v2033_v24, %v1634_v1  ;;  %v721_v25 = vmul.f32 %v3196_v30, %v3755_v33  ;;  %v620_v61 = vmul.f32 %v3186_v26, %v584_v57 }
 0x131   : > { %v2123_v16 = vadd.f32 %v2035_v5, %v1635_v0  ;;  %v621_v53 = vmul.f32 %v3186_v26, %v4269_v32  ;;  %v846_v52 = vrot.slane %v719_v45, 2  ;;  %v847_v41 = vrot.slane %v720_v15, 2 }
 0x132   : > { %v2154_v11 = vadd.f32 %v2122_v36, %v1878_v18  ;;  %v849_v60 = vrot.slane %v721_v25, 2  ;;  %v966_v17 = vmul.f32 %v3220_v42, %v4003_v4  ;;  %v652_v48 = vadd.f32 %v620_v61, %v476_v19 }
 0x133   : > { %v2155_v38 = vadd.f32 %v2123_v16, %v1879_v46  ;;  %v653_v20 = vadd.f32 %v621_v53, %v477_v23  ;;  %v967_v30 = vmul.f32 %v3220_v42, %v4008_v12  ;;  %v848_v56 = vsel %vm770_vm0, %v846_v52, %v847_v41 }
 0x134   : > { %v850_v50 = vsel %vm770_vm0, %v847_v41, %v849_v60  ;;  %v968_v26 = vmul.f32 %v3220_v42, %v4024_v10  ;;  %v1092_v31 = vrot.slane %v966_v17, 2  ;;  %v913_v40 = vadd.f32 %v848_v56, %v548_v63 }
 0x135   : > { %v2179_v9 = vpack.c.bf16 %v2155_v38, %v2154_v11  ;;  %v914_v14 = vadd.f32 %v850_v50, %v549_v27  ;;  %v1093_v2 = vrot.slane %v967_v30, 2  ;;  %v1162_v55 = vunpack.c.l.bf16 %v407_v29 }
 0x136   : > { %v1095_v1 = vrot.slane %v968_v26, 2  ;;  %v1212_v7 = vmul.f32 %v3223_v43, %v584_v57  ;;  %v1213_v0 = vmul.f32 %v3223_v43, %v4269_v32  ;;  %v1456_v37 = vmul.f32 %v3254_v8, %v3735_v59 }
 0x137   : > { %2981 = vmatmul.mubr.bf16.gmra.mrb[12].mxu0 %v2179_v9  ;;  %v1094_v62 = vsel %vm770_vm0, %v1092_v31, %v1093_v2  ;;  %v1457_v42 = vmul.f32 %v3254_v8, %v3737_v3  ;;  %v1458_v34 = vmul.f32 %v3254_v8, %v3755_v33  ;;  %v1214_v44 = vmul.f32 %v3223_v43, %v1162_v55 }
 0x138   : > { %v1096_v49 = vsel %vm770_vm0, %v1093_v2, %v1095_v1  ;;  %v1159_v13 = vadd.f32 %v1094_v62, %v652_v48  ;;  %v1338_v19 = vrot.slane %v1212_v7, 2  ;;  %v1339_v47 = vrot.slane %v1213_v0, 2 }
 0x139   : > { %v1160_v23 = vadd.f32 %v1096_v49, %v653_v20  ;;  %v1583_v51 = vrot.slane %v1456_v37, 4  ;;  %v1584_v28 = vrot.slane %v1457_v42, 4  ;;  %v1341_v63 = vrot.slane %v1214_v44, 2 }
 0x13a   : > { %v1586_v18 = vrot.slane %v1458_v34, 4  ;;  %v1701_v59 = vmul.f32 %v3276_v39, %v4003_v4  ;;  %v1702_v3 = vmul.f32 %v3276_v39, %v4008_v12  ;;  %v1340_v8 = vsel %vm770_vm0, %v1338_v19, %v1339_v47  ;;  %v4320_v4 = vld [vmem:[%s4400_s4] ss:$0 sm:$0xff] }
 0x13b   : > { %v1585_v33 = vsel %vm1507_vm1, %v1583_v51, %v1584_v28  ;;  %v1703_v43 = vmul.f32 %v3276_v39, %v4024_v10  ;;  %v1945_v46 = vmul.f32 %v4184_v54, %v584_v57  ;;  %v1342_v58 = vsel %vm770_vm0, %v1339_v47, %v1341_v63 }
 0x13c   : > { %v1405_v27 = vadd.f32 %v1340_v8, %v913_v40  ;;  %v1587_v24 = vsel %vm1507_vm1, %v1584_v28, %v1586_v18  ;;  %v1406_v12 = vadd.f32 %v1342_v58, %v914_v14  ;;  %v1650_v45 = vadd.f32 %v1585_v33, %v1159_v13 }
 0x13d   : > { %v1827_v5 = vrot.slane %v1701_v59, 4  ;;  %v1828_v36 = vrot.slane %v1702_v3, 4  ;;  %v1830_v15 = vrot.slane %v1703_v43, 4  ;;  %v1946_v39 = vmul.f32 %v4184_v54, %v4269_v32 }
 0x13e   : > { %v1947_v10 = vmul.f32 %v4184_v54, %v1162_v55  ;;  %v2071_v57 = vrot.slane %v1945_v46, 4  ;;  %v1651_v25 = vadd.f32 %v1587_v24, %v1160_v23  ;;  %v2302_v61 = vadd.f32 %v4262_v22, %v4320_v4 }
 0x13f   : > { %v1829_v16 = vsel %vm1507_vm1, %v1827_v5, %v1828_v36  ;;  %v2305_v53 = vadd.f32 %v4273_v35, %v4320_v4  ;;  %v1831_v52 = vsel %vm1507_vm1, %v1828_v36, %v1830_v15  ;;  %v2072_v11 = vrot.slane %v1946_v39, 4 }
 0x140   : > { %v2074_v41 = vrot.slane %v1947_v10, 4  ;;  %v2986_v60 = vpop.f32.mrb[0].mxu1  ;;  %v2294_v32 = vadd.f32 %v4320_v4, %v4266_v21  ;;  %v1894_v54 = vadd.f32 %v1829_v16, %v1405_v27  ;;  %v1895_v17 = vadd.f32 %v1831_v52, %v1406_v12 }
 0x141   : > { %v2357_v22 = vpop.f32.mrb[1].mxu1  ;;  %v2833_v38 = vpack.c.bf16 %v2305_v53, %v2302_v61  ;;  %v2297_v35 = vadd.f32 %v4320_v4, %v4280_v6  ;;  %v2073_v29 = vsel %vm1507_vm1, %v2071_v57, %v2072_v11  ;;  %v2366_v21 = vadd.f32 %v2986_v60, %v4320_v4 }
 0x142   : > { %v2075_v48 = vsel %vm1507_vm1, %v2072_v11, %v2074_v41  ;;  %v2987_v20 = vpop.f32.mrb[2].mxu1  ;;  %v2138_v30 = vadd.f32 %v2073_v29, %v1650_v45  ;;  %v2358_v9 = vadd.f32 %v4320_v4, %v2357_v22 }
 0x143   : > { %v2139_v56 = vadd.f32 %v2075_v48, %v1651_v25  ;;  %2913 = vst [vmem:[%s4337_s12 + $0x8] sm:$0xff] %v2833_v38   ;;  %v2369_v50 = vadd.f32 %v2987_v20, %v4320_v4  ;;  %v2828_v26 = vpack.c.bf16 %v2297_v35, %v2294_v32  ;;  %v2360_v31 = vpop.f32.mrb[3].mxu1 }
 0x144   : > { %v2361_v6 = vadd.f32 %v4320_v4, %v2360_v31  ;;  %v2170_v40 = vadd.f32 %v2138_v30, %v1894_v54 }
 0x145   : > { %v2171_v14 = vadd.f32 %v2139_v56, %v1895_v17  ;;  %v2873_v2 = vpack.c.bf16 %v2369_v50, %v2366_v21  ;;  %2829 = vst [vmem:[%s4337_s12] sm:$0xff] %v2828_v26  }
 0x146   : > { %v2868_v1 = vpack.c.bf16 %v2361_v6, %v2358_v9 }
 0x147   : > { %v2187_v55 = vpack.c.bf16 %v2171_v14, %v2170_v40  ;;  %2921 = vst [vmem:[%s4337_s12 + $0x48] sm:$0xff] %v2873_v2  }
 0x148   : > { %2920 = vst [vmem:[%s4337_s12 + $0x40] sm:$0xff] %v2868_v1  }
 0x149   : > { %2997 = vmatmul.mubr.bf16.gmra.mrb[12].mxu1 %v2187_v55 }
 0x177   : > { %v2974_v7 = vpop.f32.mrb[4].mxu0 }
 0x178   : > { %v2309_v0 = vpop.f32.mrb[5].mxu0  ;;  %v2318_v37 = vadd.f32 %v2974_v7, %v4320_v4 }
 0x179   : > { %v2975_v62 = vpop.f32.mrb[6].mxu0  ;;  %v2310_v49 = vadd.f32 %v4320_v4, %v2309_v0 }
 0x17a   : > { %v2321_v42 = vadd.f32 %v2975_v62, %v4320_v4  ;;  %v2312_v34 = vpop.f32.mrb[7].mxu0 }
 0x17b   : > { %v2313_v13 = vadd.f32 %v4320_v4, %v2312_v34 }
 0x17c   : > { %v2843_v44 = vpack.c.bf16 %v2321_v42, %v2318_v37 }
 0x17d   : > { %v2838_v19 = vpack.c.bf16 %v2313_v13, %v2310_v49 }
 0x17e   : > { %2915 = vst [vmem:[%s4337_s12 + $0x18] sm:$0xff] %v2843_v44  }
 0x17f   : > { %2914 = vst [vmem:[%s4337_s12 + $0x10] sm:$0xff] %v2838_v19  }
 0x18a   : > { %v2990_v23 = vpop.f32.mrb[4].mxu1 }
 0x18b   : > { %v2373_v47 = vpop.f32.mrb[5].mxu1  ;;  %v2382_v28 = vadd.f32 %v2990_v23, %v4320_v4 }
 0x18c   : > { %v2991_v51 = vpop.f32.mrb[6].mxu1  ;;  %v2374_v59 = vadd.f32 %v4320_v4, %v2373_v47 }
 0x18d   : > { %v2385_v63 = vadd.f32 %v2991_v51, %v4320_v4  ;;  %v2376_v18 = vpop.f32.mrb[7].mxu1 }
 0x18e   : > { %v2377_v3 = vadd.f32 %v4320_v4, %v2376_v18 }
 0x18f   : > { %v2883_v8 = vpack.c.bf16 %v2385_v63, %v2382_v28 }
 0x190   : > { %v2878_v33 = vpack.c.bf16 %v2377_v3, %v2374_v59 }
 0x191   : > { %2923 = vst [vmem:[%s4337_s12 + $0x58] sm:$0xff] %v2883_v8  }
 0x192   : > { %2922 = vst [vmem:[%s4337_s12 + $0x50] sm:$0xff] %v2878_v33  }
 0x1c0   : > { %v2978_v43 = vpop.f32.mrb[8].mxu0 }
 0x1c1   : > { %v2325_v46 = vpop.f32.mrb[9].mxu0  ;;  %v2334_v27 = vadd.f32 %v2978_v43, %v4320_v4 }
 0x1c2   : > { %v2979_v58 = vpop.f32.mrb[10].mxu0  ;;  %v2326_v45 = vadd.f32 %v4320_v4, %v2325_v46 }
 0x1c3   : > { %v2337_v24 = vadd.f32 %v2979_v58, %v4320_v4  ;;  %v2328_v12 = vpop.f32.mrb[11].mxu0 }
 0x1c4   : > { %v2329_v5 = vadd.f32 %v4320_v4, %v2328_v12 }
 0x1c5   : > { %v2853_v36 = vpack.c.bf16 %v2337_v24, %v2334_v27 }
 0x1c6   : > { %v2848_v15 = vpack.c.bf16 %v2329_v5, %v2326_v45 }
 0x1c7   : > { %2917 = vst [vmem:[%s4337_s12 + $0x28] sm:$0xff] %v2853_v36  }
 0x1c8   : > { %2916 = vst [vmem:[%s4337_s12 + $0x20] sm:$0xff] %v2848_v15  }
 0x1d4   : > { %v2994_v39 = vpop.f32.mrb[8].mxu1 }
 0x1d5   : > { %v2389_v10 = vpop.f32.mrb[9].mxu1  ;;  %v2398_v25 = vadd.f32 %v2994_v39, %v4320_v4 }
 0x1d6   : > { %v2995_v57 = vpop.f32.mrb[10].mxu1  ;;  %v2390_v53 = vadd.f32 %v4320_v4, %v2389_v10 }
 0x1d7   : > { %v2401_v16 = vadd.f32 %v2995_v57, %v4320_v4  ;;  %v2392_v61 = vpop.f32.mrb[11].mxu1 }
 0x1d8   : > { %v2393_v52 = vadd.f32 %v4320_v4, %v2392_v61 }
 0x1d9   : > { %v2893_v11 = vpack.c.bf16 %v2401_v16, %v2398_v25 }
 0x1da   : > { %v2888_v41 = vpack.c.bf16 %v2393_v52, %v2390_v53 }
 0x1db   : > { %2925 = vst [vmem:[%s4337_s12 + $0x68] sm:$0xff] %v2893_v11  }
 0x1dc   : > { %2924 = vst [vmem:[%s4337_s12 + $0x60] sm:$0xff] %v2888_v41  }
 0x20a   : > { %v2982_v60 = vpop.f32.mrb[12].mxu0 }
 0x20b   : > { %v2341_v32 = vpop.f32.mrb[13].mxu0  ;;  %v2350_v17 = vadd.f32 %v2982_v60, %v4320_v4 }
 0x20c   : > { %v2983_v54 = vpop.f32.mrb[14].mxu0  ;;  %v2342_v35 = vadd.f32 %v4320_v4, %v2341_v32 }
 0x20d   : > { %v2353_v22 = vadd.f32 %v2983_v54, %v4320_v4  ;;  %v2344_v38 = vpop.f32.mrb[15].mxu0 }
 0x20e   : > { %v2345_v29 = vadd.f32 %v4320_v4, %v2344_v38 }
 0x20f   : > { %v2863_v48 = vpack.c.bf16 %v2353_v22, %v2350_v17 }
 0x210   : > { %v2858_v21 = vpack.c.bf16 %v2345_v29, %v2342_v35 }
 0x211   : > { %2919 = vst [vmem:[%s4337_s12 + $0x38] sm:$0xff] %v2863_v48  }
 0x212   : > { %2918 = vst [vmem:[%s4337_s12 + $0x30] sm:$0xff] %v2858_v21  }
 0x21c   : > { %v2998_v20 = vpop.f32.mrb[12].mxu1 }
 0x21d   : > { %v2405_v30 = vpop.f32.mrb[13].mxu1  ;;  %v2414_v50 = vadd.f32 %v2998_v20, %v4320_v4 }
 0x21e   : > { %v2999_v56 = vpop.f32.mrb[14].mxu1  ;;  %v2406_v9 = vadd.f32 %v4320_v4, %v2405_v30 }
 0x21f   : > { %v2417_v26 = vadd.f32 %v2999_v56, %v4320_v4  ;;  %v2408_v31 = vpop.f32.mrb[15].mxu1 }
 0x220   : > { %v2409_v6 = vadd.f32 %v4320_v4, %v2408_v31 }
 0x221   : > { %v2903_v40 = vpack.c.bf16 %v2417_v26, %v2414_v50 }
 0x222   : > { %v2898_v14 = vpack.c.bf16 %v2409_v6, %v2406_v9 }
 0x223   : > { %2927 = vst [vmem:[%s4337_s12 + $0x78] sm:$0xff] %v2903_v40  }
 0x224   : > { %2926 = vst [vmem:[%s4337_s12 + $0x70] sm:$0xff] %v2898_v14  }
 0x225 PF: > { %s15_s20 = sadd.s32 1, %s3075_s20   ;;  %s4438_s18 = smov %s3071_s19 }
 0x226   : > { %p12_p5 = scmp.ge.s32.totalorder %s15_s20, 4   ;;  %s4439_s19 = smov %s4441_s21 }
 0x228   :  { %14 = sbr.rel (!%p12_p5) target bundleno = 2 (0x2), region = 73 }

</bundles_post_ra>
